<compile_context>
chip_gen: v6e
topology: v6e:2x2x1
jax: 0.10.0
libtpu: 0.0.40
codegen_flags: <defaults>
</compile_context>

<pallas_src>
import jax
import jax.numpy as jnp
from jax.experimental import pallas as pl
from jax.experimental.pallas import tpu as pltpu

LAMBDA = 0.5      # F.hardshrink default
LN_EPS = 1e-5     # nn.LayerNorm default
OUT_PAD = 128     # lane-dense output width; real logits live in lanes 0..1
NEG_BIG = -1e30   # padding-lane bias so exp() underflows to exactly 0


def _hardshrink(x):
    return jnp.where(jnp.abs(x) > LAMBDA, x, 0.0)


def _layernorm_noaffine(x):
    mu = jnp.mean(x, axis=-1, keepdims=True)
    xc = x - mu
    var = jnp.mean(xc * xc, axis=-1, keepdims=True)
    return xc * jax.lax.rsqrt(var + LN_EPS)


def net_kernel(x_ref, w1_ref, w2_ref, w3_ref, bias_ref, o_ref):
    x = x_ref[...]
    b1 = bias_ref[0:1, 0:12]      # packed-param slab: one DMA for all biases
    b2 = bias_ref[1:2, 0:6]
    b3 = bias_ref[2:3, :]         # (1, 128): real bias in lanes 0..1, -1e30 pad

    # fc1: Linear(F, 12) + hardshrink
    h = jnp.dot(x, w1_ref[...], preferred_element_type=jnp.float32) + b1
    h = _hardshrink(h)

    # fc2: LayerNorm(12)   (affine gamma/beta folded into w2/b2 in the wrapper)
    h = _layernorm_noaffine(h)

    # fc3: Dropout(0.2) -> identity in eval mode
    # TODO(synk): training-mode dropout (stateful PRNG mask) not implemented.

    # fc4: Linear(12, 6) + hardshrink
    h = jnp.dot(h, w2_ref[...], preferred_element_type=jnp.float32) + b2
    h = _hardshrink(h)

    # fc5: LayerNorm(6)    (affine folded into w3/b3)
    h = _layernorm_noaffine(h)

    # fc6: Linear(6, 2) padded to 128 lanes + softmax over dim=1
    logits = jnp.dot(h, w3_ref[...], preferred_element_type=jnp.float32) + b3
    m = jnp.max(logits, axis=-1, keepdims=True)
    e = jnp.exp(logits - m)       # padded lanes: exp(-1e30 - m) == 0
    o_ref[...] = e * pl.reciprocal(jnp.sum(e, axis=-1, keepdims=True), approx=True)


def net_forward(x, params, *, tile_b=512):
    (w1, b1, g1, be1, w2, b2, g2, be2, w3, b3) = params
    B, F_in = x.shape

    # --- eval-mode fold: LayerNorm affine into the following Linear ----------
    #   LN(z)*g + be  then  y @ W + b  ==  LNplain(z) @ (diag(g) W) + (be W + b)
    w2f = g1[:, None] * w2                      # (12, 6)
    b2f = be1 @ w2 + b2                         # (6,)
    w3f = g2[:, None] * w3                      # (6, 2)
    b3f = be2 @ w3 + b3                         # (2,)

    # --- pad fc6 to 128 output lanes (lane-dense store) ----------------------
    w3p = jnp.zeros((w3f.shape[0], OUT_PAD), jnp.float32).at[:, :2].set(w3f)
    b3p = jnp.full((OUT_PAD,), NEG_BIG, jnp.float32).at[:2].set(b3f)

    # --- pack remaining small params into one (3, 128) slab -> single DMA ----
    bias_pack = jnp.zeros((3, OUT_PAD), jnp.float32)
    bias_pack = bias_pack.at[0, :12].set(b1)
    bias_pack = bias_pack.at[1, :6].set(b2f)
    bias_pack = bias_pack.at[2, :].set(b3p)

    # --- batch grid -----------------------------------------------------------
    tb = min(tile_b, B)
    tb = max(8, (tb // 8) * 8)                  # sublane-aligned tile
    Bp = pl.cdiv(B, tb) * tb
    if Bp != B:
        x = jnp.pad(x, ((0, Bp - B), (0, 0)))

    out_padded = pl.pallas_call(
        net_kernel,
        out_shape=jax.ShapeDtypeStruct((Bp, OUT_PAD), jnp.float32),
        grid=(Bp // tb,),
        in_specs=[
            pl.BlockSpec((tb, F_in), lambda i: (i, 0)),      # x tile
            pl.BlockSpec((F_in, 12), lambda i: (0, 0)),      # w1 (resident)
            pl.BlockSpec((12, 6), lambda i: (0, 0)),         # w2 (folded)
            pl.BlockSpec((6, OUT_PAD), lambda i: (0, 0)),    # w3 (folded+padded)
            pl.BlockSpec((3, OUT_PAD), lambda i: (0, 0)),    # packed biases
        ],
        out_specs=pl.BlockSpec((tb, OUT_PAD), lambda i: (i, 0)),
        compiler_params=pltpu.CompilerParams(
            dimension_semantics=("parallel",)),
    )(x, w1, w2f, w3p, bias_pack)

    return out_padded[:B, :2]


def init_params(key, n_features):
    """Parameter init mirroring PyTorch nn.Linear defaults; LN affine params are
    perturbed from the (1, 0) defaults so the eval-mode fold is exercised."""
    ks = jax.random.split(key, 10)

    def linear(kw, kb, fan_in, fan_out):
        bound = 1.0 / jnp.sqrt(float(fan_in))
        w = jax.random.uniform(kw, (fan_in, fan_out), jnp.float32, -bound, bound)
        b = jax.random.uniform(kb, (fan_out,), jnp.float32, -bound, bound)
        return w, b

    w1, b1 = linear(ks[0], ks[1], n_features, 12)
    w2, b2 = linear(ks[2], ks[3], 12, 6)
    w3, b3 = linear(ks[4], ks[5], 6, 2)
    g1 = 1.0 + 0.1 * jax.random.normal(ks[6], (12,), jnp.float32)
    be1 = 0.1 * jax.random.normal(ks[7], (12,), jnp.float32)
    g2 = 1.0 + 0.1 * jax.random.normal(ks[8], (6,), jnp.float32)
    be2 = 0.1 * jax.random.normal(ks[9], (6,), jnp.float32)
    return (w1, b1, g1, be1, w2, b2, g2, be2, w3, b3)


def _reference(x, params):
    """Pure-JAX reference with the original (unfolded) module semantics."""
    (w1, b1, g1, be1, w2, b2, g2, be2, w3, b3) = params

    def ln(z, g, b):
        mu = jnp.mean(z, axis=-1, keepdims=True)
        var = jnp.mean((z - mu) ** 2, axis=-1, keepdims=True)
        return (z - mu) * jax.lax.rsqrt(var + LN_EPS) * g + b

    h = _hardshrink(x @ w1 + b1)
    h = ln(h, g1, be1)
    h = _hardshrink(h @ w2 + b2)
    h = ln(h, g2, be2)
    return jax.nn.softmax(h @ w3 + b3, axis=1)


if __name__ == "__main__":
    key = jax.random.PRNGKey(0)
    kx, kp = jax.random.split(key)

    B, F = 1000, 16            # tabular rows x 16 features (non-multiple of tile)
    x = jax.random.normal(kx, (B, F), jnp.float32)
    params = init_params(kp, F)

    out = net_forward(x, params, tile_b=256)
    out = jax.block_until_ready(out)

    ref = _reference(x, params)
    assert out.shape == (B, 2)
    # approx=True softmax reciprocal -> relaxed tolerance vs exact reference
    assert jnp.allclose(out, ref, atol=1e-3, rtol=1e-3), float(jnp.max(jnp.abs(out - ref)))
    assert jnp.allclose(jnp.sum(out, axis=1), 1.0, atol=1e-3)

    print("KERNEL_OK")
</pallas_src>

<mosaic_0001>
module attributes {stable_mosaic.version = 11 : i64} {
  func.func @net_kernel(%arg0: i32, %arg1: memref<256x16xf32, #tpu.memory_space<vmem>>, %arg2: memref<16x12xf32, #tpu.memory_space<vmem>>, %arg3: memref<12x6xf32, #tpu.memory_space<vmem>>, %arg4: memref<6x128xf32, #tpu.memory_space<vmem>>, %arg5: memref<3x128xf32, #tpu.memory_space<vmem>>, %arg6: memref<256x128xf32, #tpu.memory_space<vmem>>) attributes {dimension_semantics = [#tpu.dimension_semantics<parallel>], iteration_bounds = array<i64: 4>, scalar_prefetch = 0 : i64, scratch_operands = 0 : i64, tpu.core_type = #tpu.core_type<tc>, window_params = [{transform_indices = @transform_0, window_bounds = array<i64: 256, 16>}, {pipeline_mode = #tpu.pipeline_mode<synchronous>, transform_indices = @transform_1, window_bounds = array<i64: 16, 12>}, {pipeline_mode = #tpu.pipeline_mode<synchronous>, transform_indices = @transform_2, window_bounds = array<i64: 12, 6>}, {pipeline_mode = #tpu.pipeline_mode<synchronous>, transform_indices = @transform_3, window_bounds = array<i64: 6, 128>}, {pipeline_mode = #tpu.pipeline_mode<synchronous>, transform_indices = @transform_4, window_bounds = array<i64: 3, 128>}, {transform_indices = @transform_5, window_bounds = array<i64: 256, 128>}]} {
    %c0 = arith.constant 0 : index
    %c0_0 = arith.constant 0 : index
    %0 = vector.load %arg1[%c0, %c0_0] : memref<256x16xf32, #tpu.memory_space<vmem>>, vector<256x16xf32>
    %c0_1 = arith.constant 0 : index
    %c0_2 = arith.constant 0 : index
    %1 = vector.load %arg5[%c0_1, %c0_2] : memref<3x128xf32, #tpu.memory_space<vmem>>, vector<1x12xf32>
    %c1 = arith.constant 1 : index
    %c0_3 = arith.constant 0 : index
    %2 = vector.load %arg5[%c1, %c0_3] : memref<3x128xf32, #tpu.memory_space<vmem>>, vector<1x6xf32>
    %c2 = arith.constant 2 : index
    %c0_4 = arith.constant 0 : index
    %3 = vector.load %arg5[%c2, %c0_4] : memref<3x128xf32, #tpu.memory_space<vmem>>, vector<1x128xf32>
    %c0_5 = arith.constant 0 : index
    %c0_6 = arith.constant 0 : index
    %4 = vector.load %arg2[%c0_5, %c0_6] : memref<16x12xf32, #tpu.memory_space<vmem>>, vector<16x12xf32>
    %cst = arith.constant dense<0.000000e+00> : vector<256x12xf32>
    %5 = tpu.matmul %0, %4, %cst {dimension_numbers = #tpu.dot_dimension_numbers<[1], [0], [0], [1], [0, 0, 1, 1], [], []>} : vector<256x16xf32>, vector<16x12xf32>, vector<256x12xf32> -> vector<256x12xf32>
    %6 = vector.broadcast %1 : vector<1x12xf32> to vector<256x12xf32>
    %7 = arith.addf %5, %6 : vector<256x12xf32>
    %8 = math.absf %7 : vector<256x12xf32>
    %cst_7 = arith.constant 5.000000e-01 : f32
    %9 = vector.broadcast %cst_7 : f32 to vector<256x12xf32>
    %10 = arith.cmpf ogt, %8, %9 : vector<256x12xf32>
    %cst_8 = arith.constant 0.000000e+00 : f32
    %11 = vector.broadcast %cst_8 : f32 to vector<256x12xf32>
    %12 = arith.select %10, %7, %11 : vector<256x12xi1>, vector<256x12xf32>
    %cst_9 = arith.constant dense<0.000000e+00> : vector<256xf32>
    %13 = vector.multi_reduction <add>, %12, %cst_9 [1] : vector<256x12xf32> to vector<256xf32>
    %14 = vector.shape_cast %13 : vector<256xf32> to vector<256x1xf32>
    %cst_10 = arith.constant 1.200000e+01 : f32
    %15 = vector.broadcast %cst_10 : f32 to vector<256x1xf32>
    %16 = arith.divf %14, %15 : vector<256x1xf32>
    %17 = vector.broadcast %16 : vector<256x1xf32> to vector<256x12xf32>
    %18 = arith.subf %12, %17 : vector<256x12xf32>
    %19 = arith.mulf %18, %18 : vector<256x12xf32>
    %cst_11 = arith.constant dense<0.000000e+00> : vector<256xf32>
    %20 = vector.multi_reduction <add>, %19, %cst_11 [1] : vector<256x12xf32> to vector<256xf32>
    %21 = vector.shape_cast %20 : vector<256xf32> to vector<256x1xf32>
    %cst_12 = arith.constant 1.200000e+01 : f32
    %22 = vector.broadcast %cst_12 : f32 to vector<256x1xf32>
    %23 = arith.divf %21, %22 : vector<256x1xf32>
    %cst_13 = arith.constant 9.99999974E-6 : f32
    %24 = vector.broadcast %cst_13 : f32 to vector<256x1xf32>
    %25 = arith.addf %23, %24 : vector<256x1xf32>
    %26 = math.rsqrt %25 : vector<256x1xf32>
    %27 = vector.broadcast %26 : vector<256x1xf32> to vector<256x12xf32>
    %28 = arith.mulf %18, %27 : vector<256x12xf32>
    %c0_14 = arith.constant 0 : index
    %c0_15 = arith.constant 0 : index
    %29 = vector.load %arg3[%c0_14, %c0_15] : memref<12x6xf32, #tpu.memory_space<vmem>>, vector<12x6xf32>
    %cst_16 = arith.constant dense<0.000000e+00> : vector<256x6xf32>
    %30 = tpu.matmul %28, %29, %cst_16 {dimension_numbers = #tpu.dot_dimension_numbers<[1], [0], [0], [1], [0, 0, 1, 1], [], []>} : vector<256x12xf32>, vector<12x6xf32>, vector<256x6xf32> -> vector<256x6xf32>
    %31 = vector.broadcast %2 : vector<1x6xf32> to vector<256x6xf32>
    %32 = arith.addf %30, %31 : vector<256x6xf32>
    %33 = math.absf %32 : vector<256x6xf32>
    %cst_17 = arith.constant 5.000000e-01 : f32
    %34 = vector.broadcast %cst_17 : f32 to vector<256x6xf32>
    %35 = arith.cmpf ogt, %33, %34 : vector<256x6xf32>
    %cst_18 = arith.constant 0.000000e+00 : f32
    %36 = vector.broadcast %cst_18 : f32 to vector<256x6xf32>
    %37 = arith.select %35, %32, %36 : vector<256x6xi1>, vector<256x6xf32>
    %cst_19 = arith.constant dense<0.000000e+00> : vector<256xf32>
    %38 = vector.multi_reduction <add>, %37, %cst_19 [1] : vector<256x6xf32> to vector<256xf32>
    %39 = vector.shape_cast %38 : vector<256xf32> to vector<256x1xf32>
    %cst_20 = arith.constant 6.000000e+00 : f32
    %40 = vector.broadcast %cst_20 : f32 to vector<256x1xf32>
    %41 = arith.divf %39, %40 : vector<256x1xf32>
    %42 = vector.broadcast %41 : vector<256x1xf32> to vector<256x6xf32>
    %43 = arith.subf %37, %42 : vector<256x6xf32>
    %44 = arith.mulf %43, %43 : vector<256x6xf32>
    %cst_21 = arith.constant dense<0.000000e+00> : vector<256xf32>
    %45 = vector.multi_reduction <add>, %44, %cst_21 [1] : vector<256x6xf32> to vector<256xf32>
    %46 = vector.shape_cast %45 : vector<256xf32> to vector<256x1xf32>
    %cst_22 = arith.constant 6.000000e+00 : f32
    %47 = vector.broadcast %cst_22 : f32 to vector<256x1xf32>
    %48 = arith.divf %46, %47 : vector<256x1xf32>
    %cst_23 = arith.constant 9.99999974E-6 : f32
    %49 = vector.broadcast %cst_23 : f32 to vector<256x1xf32>
    %50 = arith.addf %48, %49 : vector<256x1xf32>
    %51 = math.rsqrt %50 : vector<256x1xf32>
    %52 = vector.broadcast %51 : vector<256x1xf32> to vector<256x6xf32>
    %53 = arith.mulf %43, %52 : vector<256x6xf32>
    %c0_24 = arith.constant 0 : index
    %c0_25 = arith.constant 0 : index
    %54 = vector.load %arg4[%c0_24, %c0_25] : memref<6x128xf32, #tpu.memory_space<vmem>>, vector<6x128xf32>
    %cst_26 = arith.constant dense<0.000000e+00> : vector<256x128xf32>
    %55 = tpu.matmul %53, %54, %cst_26 {dimension_numbers = #tpu.dot_dimension_numbers<[1], [0], [0], [1], [0, 0, 1, 1], [], []>} : vector<256x6xf32>, vector<6x128xf32>, vector<256x128xf32> -> vector<256x128xf32>
    %56 = vector.broadcast %3 : vector<1x128xf32> to vector<256x128xf32>
    %57 = arith.addf %55, %56 : vector<256x128xf32>
    %cst_27 = arith.constant dense<0xFF800000> : vector<256xf32>
    %58 = vector.multi_reduction <maximumf>, %57, %cst_27 [1] : vector<256x128xf32> to vector<256xf32>
    %59 = vector.shape_cast %58 : vector<256xf32> to vector<256x1xf32>
    %60 = vector.broadcast %59 : vector<256x1xf32> to vector<256x128xf32>
    %61 = arith.subf %57, %60 : vector<256x128xf32>
    %62 = math.exp %61 : vector<256x128xf32>
    %cst_28 = arith.constant dense<0.000000e+00> : vector<256xf32>
    %63 = vector.multi_reduction <add>, %62, %cst_28 [1] : vector<256x128xf32> to vector<256xf32>
    %64 = vector.shape_cast %63 : vector<256xf32> to vector<256x1xf32>
    %65 = tpu.reciprocal %64 {approx = true} : vector<256x1xf32> -> vector<256x1xf32>
    %66 = vector.broadcast %65 : vector<256x1xf32> to vector<256x128xf32>
    %67 = arith.mulf %62, %66 : vector<256x128xf32>
    %c0_29 = arith.constant 0 : index
    %c0_30 = arith.constant 0 : index
    %68 = vector.load %arg6[%c0_29, %c0_30] : memref<256x128xf32, #tpu.memory_space<vmem>>, vector<256x128xf32>
    tpu.vector_store %arg6[%c0_29, %c0_30], %67 {strides = array<i32>} : memref<256x128xf32, #tpu.memory_space<vmem>>, vector<256x128xf32>,
    return
  }
  func.func @transform_0(%arg0: i32) -> (i32, i32) {
    %c0_i32 = arith.constant 0 : i32
    %c0_i32_0 = arith.constant 0 : i32
    return %arg0, %c0_i32 : i32, i32
  }
  func.func @transform_1(%arg0: i32) -> (i32, i32) {
    %c0_i32 = arith.constant 0 : i32
    %c0_i32_0 = arith.constant 0 : i32
    %c0_i32_1 = arith.constant 0 : i32
    return %c0_i32, %c0_i32_0 : i32, i32
  }
  func.func @transform_2(%arg0: i32) -> (i32, i32) {
    %c0_i32 = arith.constant 0 : i32
    %c0_i32_0 = arith.constant 0 : i32
    %c0_i32_1 = arith.constant 0 : i32
    return %c0_i32, %c0_i32_0 : i32, i32
  }
  func.func @transform_3(%arg0: i32) -> (i32, i32) {
    %c0_i32 = arith.constant 0 : i32
    %c0_i32_0 = arith.constant 0 : i32
    %c0_i32_1 = arith.constant 0 : i32
    return %c0_i32, %c0_i32_0 : i32, i32
  }
  func.func @transform_4(%arg0: i32) -> (i32, i32) {
    %c0_i32 = arith.constant 0 : i32
    %c0_i32_0 = arith.constant 0 : i32
    %c0_i32_1 = arith.constant 0 : i32
    return %c0_i32, %c0_i32_0 : i32, i32
  }
  func.func @transform_5(%arg0: i32) -> (i32, i32) {
    %c0_i32 = arith.constant 0 : i32
    %c0_i32_0 = arith.constant 0 : i32
    return %arg0, %c0_i32 : i32, i32
  }
}

</mosaic_0001>

<bundles_post_ra>
// kernel: tpu_custom_call.1
= control target key start
LH: loop header
LB: loop body
LE: loop exit
PB: predicated region body
PF: predicated region fallthrough
CT: control target
= control target key end

     0   :  { %10 = vsyncpa [#allocation3], 0  ;;  %s4822_s0 = inlined_call_operand.vmem [shape: f32[1024,16], index: 0, kind: input, shape index: {}]   ;;  %s4823_s1 = inlined_call_operand.vmem [shape: f32[16,12], index: 1, kind: input, shape index: {}]   ;;  %s4824_s2 = inlined_call_operand.vmem [shape: f32[12,6], index: 2, kind: input, shape index: {}]   ;;  %s4825_s3 = inlined_call_operand.vmem [shape: f32[6,128], index: 3, kind: input, shape index: {}]   ;;  %s4826_s4 = inlined_call_operand.vmem [shape: f32[3,128], index: 4, kind: input, shape index: {}]   ;;  %s4827_s5 = inlined_call_operand.hbm [shape: f32[1024,128], index: 5, kind: output, shape index: {}]  }
   0x1   :  { %12 = vsyncpa [#allocation3 + $0x1], 0  ;;  %s3439_s18 = smov 0   ;;  %s3441_s19 = smov 0  }
   0x2   :  { %s3443_s20 = smov 0   ;;  %s3445_s21 = smov 0  }
   0x3 LB: > { %s3460_s22 = sadd.s32 4294967295, %s3404_s21   ;;  %s2674_s23 = sadd.s32 4294967294, %s3404_s21   ;;  %s3404_s21 = sphi %s3445_s21, %s4833_s21   ;;  %s3400_s20 = sphi %s3443_s20, %s4832_s20   ;;  %s3396_s19 = sphi %s3441_s19, %s4831_s19   ;;  %s3392_s18 = sphi %s3439_s18, %s4830_s18  }
   0x4   : > { %s3464_s24 = sadd.s32 1, %s3404_s21   ;;  %s135_s25 = sadd.s32 1, %s3400_s20 }
   0x5   : > { %s132_s26 = ssub.s32 %s3404_s21, %s3464_s24  ;;  %p145_p0 = scmp.ne.s32.totalorder %s3400_s20, %s3396_s19 }
   0x6   : > { %p133_p1 = scmp.eq.s32.totalorder %s132_s26, 0  ;;  %p146_p2 = scmp.eq.s32.totalorder %s3460_s22, 3 }
   0x7   : > { %p151_p3 = scmp.ne.s32.totalorder %s3396_s19, %s3392_s18  ;;  %p152_p4 = scmp.eq.s32.totalorder %s2674_s23, 3 }
   0x8   : > { %s3475_s27 = scalar_select %p133_p1, %s3400_s20, %s135_s25  }
   0x9   : > { %p3477_p5 = por %p146_p2, %p145_p0  ;;  %p3481_p6 = por %p152_p4, %p151_p3 }
   0xa   : > { %p2677_p7 = scmp.ge.s32.totalorder %s3404_s21, 1  ;;  %p191_p8 = scmp.lt.s32.totalorder %s3404_s21, 5 }
   0xc   : > { %p192_p9 = pnand %p2677_p7, %p191_p8 }
   0xd   : > { %s2679_s9 = sshll.u32 (!%p192_p9), %s3460_s22, 5  ;;  %s3406_s25 = smov (!%p192_p9), [#allocation2]  }
   0xe   : > { %195 = sbr.rel (%p192_p9) target bundleno = 1621 (0x655), region = 40  ;;  %p220_p10 = scmp.lt.s32.totalorder (!%p192_p9), %s2679_s9, 127 }
   0xf   : > { %s3348_s26 = sshll.u32 (!%p192_p9), %s3406_s25, 4  ;;  %s3349_s26 = int_to_ptr.vmem [resolvable:$false] %s3348_s26 }
  0x10   : > { %s3350_s30 = scalar_lea.vmem (!%p192_p9), %s3349_s26, 8192 }
  0x13   : > { %v262_v0 = vld [vmem:[%s4823_s1 + $0x8] sm:$0xff]  ;;  %v261_v1 = vld [vmem:[%s4823_s1] sm:$0xff]  ;;  %s4835_s9 = smov (!%p220_p10, %s2679_s9), 127  ;;  %vm267_vm0 = vcmask 130048   ;;  %vm685_vm3 = vcmask 97280  }
  0x14   : > { %2889 = vmatprep.subr.mxu0 %v262_v0  ;;  %3043 = vmatprep.subr.mxu1 %v262_v0  ;;  %s2680_s10 = sshll.u32 %s4835_s9, 3  ;;  %v3566_v34 = vld [vmem:[%s4826_s4] ss:$0 sm:$0xff] }
  0x15   : > { %2890 = vmatpush3.msra.mxu0 %v262_v0  ;;  %3045 = vmatpush3.msra.mxu1 %v262_v0  ;;  %s3497_s13 = scalar_lea.vmem %s4822_s0, %s2680_s10  ;;  %s216_s10 = sand.u32 1, %s3396_s19  }
  0x16   : > { %2891 = vmatprep.subr.mxu0 %v261_v1  ;;  %3044 = vmatprep.subr.mxu1 %v261_v1  ;;  %v226_v2 = vld [vmem:[%s3497_s13] sm:$0xff]  ;;  %v227_v3 = vld [vmem:[%s3497_s13 + $0x8] sm:$0xff]  ;;  %v228_v4 = vld [vmem:[%s3497_s13 + $0x10] sm:$0xff]  ;;  %s2678_s11 = sshll.u32 %s216_s10, 8 }
  0x17   : > { %2892 = vmatpush3.msra.mxu0 %v261_v1  ;;  %3046 = vmatpush3.msra.mxu1 %v261_v1  ;;  %v229_v5 = vld [vmem:[%s3497_s13 + $0x18] sm:$0xff]  ;;  %v230_v6 = vld [vmem:[%s3497_s13 + $0x20] sm:$0xff]  ;;  %v243_v8 = vld [vmem:[%s3497_s13 + $0x88] sm:$0xff]  ;;  %s4706_s12 = scalar_lea.vmem [#allocation2], %s2678_s11 }
  0x18   : > { %2893 = vmatprep.mubr.msk.f32.mxu0 %vm267_vm0, %v226_v2  ;;  %v242_v7 = vld [vmem:[%s3497_s13 + $0x80] sm:$0xff]  ;;  %v244_v9 = vld [vmem:[%s3497_s13 + $0x90] sm:$0xff]  ;;  %v231_v10 = vld [vmem:[%s3497_s13 + $0x28] sm:$0xff]  ;;  %s2612_s14 = sshll.u32 %s4706_s12, 4  ;;  %s4775_s14 = int_to_ptr.vmem [resolvable:$true] %s2612_s14 }
  0x19   : > { %2894 = vmatmul.mubr.msk.f32.vlgmr.msra.gmra.mxu0 %vm267_vm0, %v227_v3  ;;  %2917 = vmatprep.mubr.msk.f32.mxu1 %vm267_vm0, %v242_v7  ;;  %v232_v11 = vld [vmem:[%s3497_s13 + $0x30] sm:$0xff]  ;;  %v245_v12 = vld [vmem:[%s3497_s13 + $0x98] sm:$0xff]  ;;  %v246_v13 = vld [vmem:[%s3497_s13 + $0xa0] sm:$0xff]  ;;  %s3344_s23 = scalar_lea.vmem %s4775_s14, 4096  ;;  %p3351_p0 = scmp.lt.s32.totalorder %s4775_s14, %s3349_s26 }
  0x1a   : > { %2896 = vmatprep.mubr.msk.f32.mxu0 %vm267_vm0, %v228_v4  ;;  %2918 = vmatmul.mubr.msk.f32.vlgmr.msra.gmra.mxu1 %vm267_vm0, %v243_v8  ;;  %v233_v14 = vld [vmem:[%s3497_s13 + $0x38] sm:$0xff]  ;;  %v234_v15 = vld [vmem:[%s3497_s13 + $0x40] sm:$0xff]  ;;  %v247_v16 = vld [vmem:[%s3497_s13 + $0xa8] sm:$0xff]  ;;  %p3345_p11 = scmp.ne.s32.totalorder %s4775_s14, %s3344_s23  ;;  %p3352_p1 = scmp.lt.s32.totalorder %s3350_s30, %s3344_s23 }
  0x1b   : > { %2920 = vmatprep.mubr.msk.f32.mxu1 %vm267_vm0, %v244_v9  ;;  %v248_v17 = vld [vmem:[%s3497_s13 + $0xb0] sm:$0xff]  ;;  %v235_v18 = vld [vmem:[%s3497_s13 + $0x48] sm:$0xff]  ;;  %v249_v20 = vld [vmem:[%s3497_s13 + $0xb8] sm:$0xff] }
  0x1c   : > { %v236_v19 = vld [vmem:[%s3497_s13 + $0x50] sm:$0xff]  ;;  %v250_v21 = vld [vmem:[%s3497_s13 + $0xc0] sm:$0xff]  ;;  %v237_v22 = vld [vmem:[%s3497_s13 + $0x58] sm:$0xff]  ;;  %p3346_p12 = pnand %p3345_p11, %p3477_p5  ;;  %p3353_p2 = por %p3352_p1, %p3351_p0 }
  0x1d   : > { %2897 = vmatmul.mubr.msk.f32.gmra.mxu0 %vm267_vm0, %v229_v5  ;;  %v238_v23 = vld [vmem:[%s3497_s13 + $0x60] sm:$0xff]  ;;  %v251_v24 = vld [vmem:[%s3497_s13 + $0xc8] sm:$0xff]  ;;  %v252_v25 = vld [vmem:[%s3497_s13 + $0xd0] sm:$0xff] }
  0x1e   : > { %2899 = vmatprep.mubr.msk.f32.mxu0 %vm267_vm0, %v230_v6  ;;  %2921 = vmatmul.mubr.msk.f32.gmra.mxu1 %vm267_vm0, %v245_v12  ;;  %v239_v26 = vld [vmem:[%s3497_s13 + $0x68] sm:$0xff]  ;;  %v240_v27 = vld [vmem:[%s3497_s13 + $0x70] sm:$0xff]  ;;  %v253_v28 = vld [vmem:[%s3497_s13 + $0xd8] sm:$0xff]  ;;  %p3347_p13 = pneg %p3346_p12 }
  0x1f   : > { %2923 = vmatprep.mubr.msk.f32.mxu1 %vm267_vm0, %v246_v13  ;;  %v254_v29 = vld [vmem:[%s3497_s13 + $0xe0] sm:$0xff]  ;;  %v241_v30 = vld [vmem:[%s3497_s13 + $0x78] sm:$0xff]  ;;  %v255_v31 = vld [vmem:[%s3497_s13 + $0xe8] sm:$0xff] }
  0x20   : > { %v256_v32 = vld [vmem:[%s3497_s13 + $0xf0] sm:$0xff]  ;;  %v257_v33 = vld [vmem:[%s3497_s13 + $0xf8] sm:$0xff]  ;;  %s2787_s13 = sshll.u32 %s3460_s22, 12  ;;  %s4782_s22 = scalar_lea.sflag [#allocation3], %s216_s10 }
  0x21   : > { %2900 = vmatmul.mubr.msk.f32.gmra.mxu0 %vm267_vm0, %v231_v10  ;;  %s4773_s17 = scalar_lea.hbm %s4827_s5, %s2787_s13  ;;  %p3354_p3 = pnand %p3353_p2, %p3347_p13 }
  0x22   : > { %2902 = vmatprep.mubr.msk.f32.mxu0 %vm267_vm0, %v232_v11  ;;  %2924 = vmatmul.mubr.msk.f32.gmra.mxu1 %vm267_vm0, %v247_v16 }
  0x23   : > { %2926 = vmatprep.mubr.msk.f32.mxu1 %vm267_vm0, %v248_v17 }
  0x25   : > { %2903 = vmatmul.mubr.msk.f32.gmra.mxu0 %vm267_vm0, %v233_v14 }
  0x26   : > { %2905 = vmatprep.mubr.msk.f32.mxu0 %vm267_vm0, %v234_v15  ;;  %2927 = vmatmul.mubr.msk.f32.gmra.mxu1 %vm267_vm0, %v249_v20 }
  0x27   : > { %2929 = vmatprep.mubr.msk.f32.mxu1 %vm267_vm0, %v250_v21 }
  0x29   : > { %2906 = vmatmul.mubr.msk.f32.gmra.mxu0 %vm267_vm0, %v235_v18 }
  0x2a   : > { %2908 = vmatprep.mubr.msk.f32.mxu0 %vm267_vm0, %v236_v19  ;;  %2930 = vmatmul.mubr.msk.f32.gmra.mxu1 %vm267_vm0, %v251_v24 }
  0x2b   : > { %2932 = vmatprep.mubr.msk.f32.mxu1 %vm267_vm0, %v252_v25 }
  0x2d   : > { %2909 = vmatmul.mubr.msk.f32.gmra.mxu0 %vm267_vm0, %v237_v22 }
  0x2e   : > { %2911 = vmatprep.mubr.msk.f32.mxu0 %vm267_vm0, %v238_v23  ;;  %2933 = vmatmul.mubr.msk.f32.gmra.mxu1 %vm267_vm0, %v253_v28 }
  0x2f   : > { %2935 = vmatprep.mubr.msk.f32.mxu1 %vm267_vm0, %v254_v29 }
  0x31   : > { %2912 = vmatmul.mubr.msk.f32.gmra.mxu0 %vm267_vm0, %v239_v26 }
  0x32   : > { %2914 = vmatprep.mubr.msk.f32.mxu0 %vm267_vm0, %v240_v27  ;;  %2936 = vmatmul.mubr.msk.f32.gmra.mxu1 %vm267_vm0, %v255_v31 }
  0x33   : > { %2938 = vmatprep.mubr.msk.f32.mxu1 %vm267_vm0, %v256_v32 }
  0x35   : > { %2915 = vmatmul.mubr.msk.f32.gmra.mxu0 %vm267_vm0, %v241_v30 }
  0x36   : > { %2939 = vmatmul.mubr.msk.f32.gmra.mxu1 %vm267_vm0, %v257_v33 }
  0xd9   : > { %v2895_v35 = vpop.f32.mrf.mxu0 }
  0xda   : > { %v436_v36 = vadd.f32 %v2895_v35, %v3566_v34  ;;  %v3571_v43 = vpop.f32.mrf.mxu1 }
  0xdb   : > { %v430_v37 = vpop.f32.mrf.mxu0 }
  0xdc   : > { %v590_v38 = vand.u32 2147483647, %v436_v36  ;;  %v431_v39 = vadd.f32 %v3566_v34, %v430_v37  ;;  %v3574_v47 = vpop.f32.mrf.mxu1 }
  0xdd   : > { %v2898_v40 = vpop.f32.mrf.mxu0 }
  0xde   : > { %v446_v41 = vadd.f32 %v2898_v40, %v3566_v34  ;;  %v589_v42 = vand.u32 2147483647, %v431_v39  ;;  %vm622_vm2 = vcmp.gt.f32.partialorder %v590_v38, 0.5  ;;  %v3581_v53 = vpop.f32.mrf.mxu1 }
  0xdf   : > { %v440_v44 = vpop.f32.mrf.mxu0  ;;  %v3583_v55 = vsel %vm622_vm2, %v436_v36, 0.0 }
  0xe0   : > { %v592_v45 = vand.u32 2147483647, %v446_v41  ;;  %v441_v46 = vadd.f32 %v3566_v34, %v440_v44  ;;  %vm621_vm1 = vcmp.gt.f32.partialorder %v589_v42, 0.5  ;;  %v3586_v58 = vpop.f32.mrf.mxu1  ;;  %v689_v0 = vsel %vm685_vm3, %v3583_v55, 0.0 }
  0xe1   : > { %v2901_v48 = vpop.f32.mrf.mxu0  ;;  %v3576_v49 = vsel %vm621_vm1, %v431_v39, 0.0  ;;  %v511_v39 = vadd.f32 %v3566_v34, %v3574_v47  ;;  %v516_v47 = vadd.f32 %v3571_v43, %v3566_v34 }
  0xe2   : > { %v456_v50 = vadd.f32 %v2901_v48, %v3566_v34  ;;  %v686_v51 = vsel %vm685_vm3, %v3576_v49, 0.0  ;;  %v591_v52 = vand.u32 2147483647, %v441_v46  ;;  %vm624_vm5 = vcmp.gt.f32.partialorder %v592_v45, 0.5  ;;  %v3595_v1 = vpop.f32.mrf.mxu1 }
  0xe3   : > { %v450_v54 = vpop.f32.mrf.mxu0  ;;  %687 = vadd.xlane.f32.xlu0 %v686_v51  ;;  %v3597_v3 = vsel %vm624_vm5, %v446_v41, 0.0 }
  0xe4   : > { %v594_v56 = vand.u32 2147483647, %v456_v50  ;;  %v451_v57 = vadd.f32 %v3566_v34, %v450_v54  ;;  %vm623_vm4 = vcmp.gt.f32.partialorder %v591_v52, 0.5  ;;  %v3600_v6 = vpop.f32.mrf.mxu1  ;;  %v695_v11 = vsel %vm685_vm3, %v3597_v3, 0.0 }
  0xe5   : > { %v2904_v59 = vpop.f32.mrf.mxu0  ;;  %v3588_v60 = vsel %vm623_vm4, %v441_v46, 0.0  ;;  %v605_v54 = vand.u32 2147483647, %v511_v39 }
  0xe6   : > { %v593_v61 = vand.u32 2147483647, %v451_v57  ;;  %v466_v62 = vadd.f32 %v2904_v59, %v3566_v34  ;;  %v692_v63 = vsel %vm685_vm3, %v3588_v60, 0.0  ;;  %vm626_vm7 = vcmp.gt.f32.partialorder %v594_v56, 0.5  ;;  %v3609_v13 = vpop.f32.mrf.mxu1 }
  0xe7   : > { %v460_v2 = vpop.f32.mrf.mxu0  ;;  %693 = vadd.xlane.f32.xlu1 %v692_v63  ;;  %690 = vadd.xlane.f32.xlu0 %v689_v0  ;;  %v3611_v15 = vsel %vm626_vm7, %v456_v50, 0.0  ;;  %vm637_vm0 = vcmp.gt.f32.partialorder %v605_v54, 0.5 }
  0xe8   : > { %v596_v4 = vand.u32 2147483647, %v466_v62  ;;  %v461_v5 = vadd.f32 %v3566_v34, %v460_v2  ;;  %vm625_vm6 = vcmp.gt.f32.partialorder %v593_v61, 0.5  ;;  %v3616_v20 = vpop.f32.mrf.mxu1  ;;  %v701_v23 = vsel %vm685_vm3, %v3611_v15, 0.0 }
  0xe9   : > { %v2907_v7 = vpop.f32.mrf.mxu0  ;;  %v3602_v8 = vsel %vm625_vm6, %v451_v57, 0.0  ;;  %v521_v57 = vadd.f32 %v3566_v34, %v3586_v58 }
  0xea   : > { %v595_v9 = vand.u32 2147483647, %v461_v5  ;;  %v476_v10 = vadd.f32 %v2907_v7, %v3566_v34  ;;  %v698_v12 = vsel %vm685_vm3, %v3602_v8, 0.0  ;;  %vm628_vm9 = vcmp.gt.f32.partialorder %v596_v4, 0.5  ;;  %v3628_v31 = vpop.f32.mrf.mxu1 }
  0xeb   : > { %v470_v14 = vpop.f32.mrf.mxu0  ;;  %696 = vadd.xlane.f32.xlu1 %v695_v11  ;;  %699 = vadd.xlane.f32.xlu0 %v698_v12  ;;  %v3623_v26 = vsel %vm628_vm9, %v466_v62, 0.0  ;;  %v606_v4 = vand.u32 2147483647, %v516_v47  ;;  %v607_v7 = vand.u32 2147483647, %v521_v57 }
  0xec   : > { %v598_v16 = vand.u32 2147483647, %v476_v10  ;;  %v471_v17 = vadd.f32 %v3566_v34, %v470_v14  ;;  %vm627_vm8 = vcmp.gt.f32.partialorder %v595_v9, 0.5  ;;  %v707_v35 = vsel %vm685_vm3, %v3623_v26, 0.0  ;;  %v550_v45 = vpop.f32.mrf.mxu1 }
  0xed   : > { %v2910_v18 = vpop.f32.mrf.mxu0  ;;  %v3614_v19 = vsel %vm627_vm8, %v461_v5, 0.0  ;;  %v526_v5 = vadd.f32 %v3581_v53, %v3566_v34  ;;  %v531_v9 = vadd.f32 %v3566_v34, %v3600_v6  ;;  %v536_v14 = vadd.f32 %v3595_v1, %v3566_v34 }
  0xee   : > { %v597_v21 = vand.u32 2147483647, %v471_v17  ;;  %v486_v22 = vadd.f32 %v2910_v18, %v3566_v34  ;;  %v704_v24 = vsel %vm685_vm3, %v3614_v19, 0.0  ;;  %vm630_vm11 = vcmp.gt.f32.partialorder %v598_v16, 0.5  ;;  %v2934_v63 = vpop.f32.mrf.mxu1 }
  0xef   : > { %v480_v25 = vpop.f32.mrf.mxu0  ;;  %702 = vadd.xlane.f32.xlu1 %v701_v23  ;;  %705 = vadd.xlane.f32.xlu0 %v704_v24  ;;  %v3635_v38 = vsel %vm630_vm11, %v476_v10, 0.0  ;;  %vm638_vm4 = vcmp.gt.f32.partialorder %v606_v4, 0.5  ;;  %v608_v6 = vand.u32 2147483647, %v526_v5  ;;  %v609_v18 = vand.u32 2147483647, %v531_v9 }
  0xf0   : > { %v600_v27 = vand.u32 2147483647, %v486_v22  ;;  %v481_v28 = vadd.f32 %v3566_v34, %v480_v25  ;;  %vm629_vm10 = vcmp.gt.f32.partialorder %v597_v21, 0.5  ;;  %v713_v50 = vsel %vm685_vm3, %v3635_v38, 0.0  ;;  %v560_v11 = vpop.f32.mrf.mxu1 }
  0xf1   : > { %v2913_v29 = vpop.f32.mrf.mxu0  ;;  %v3626_v30 = vsel %vm629_vm10, %v471_v17, 0.0  ;;  %v3676_v17 = vsel %vm637_vm0, %v511_v39, 0.0  ;;  %v541_v21 = vadd.f32 %v3566_v34, %v3616_v20  ;;  %vm639_vm5 = vcmp.gt.f32.partialorder %v607_v7, 0.5 }
  0xf2   : > { %v599_v32 = vand.u32 2147483647, %v481_v28  ;;  %v496_v33 = vadd.f32 %v2913_v29, %v3566_v34  ;;  %v710_v36 = vsel %vm685_vm3, %v3626_v30, 0.0  ;;  %vm632_vm13 = vcmp.gt.f32.partialorder %v600_v27, 0.5 }
  0xf3   : > { %v490_v37 = vpop.f32.mrf.mxu0  ;;  %708 = vadd.xlane.f32.xlu1 %v707_v35  ;;  %711 = vadd.xlane.f32.xlu0 %v710_v36  ;;  %v3649_v56 = vsel %vm632_vm13, %v486_v22, 0.0  ;;  %v2937_v22 = vpop.f32.mrf.mxu1  ;;  %v734_v1 = vsel %vm685_vm3, %v3676_v17, 0.0  ;;  %v610_v24 = vand.u32 2147483647, %v536_v14  ;;  %v546_v25 = vadd.f32 %v3609_v13, %v3566_v34 }
  0xf4   : > { %v602_v40 = vand.u32 2147483647, %v496_v33  ;;  %v491_v41 = vadd.f32 %v3566_v34, %v490_v37  ;;  %vm631_vm12 = vcmp.gt.f32.partialorder %v599_v32, 0.5  ;;  %v719_v43 = vsel %vm685_vm3, %v3649_v56, 0.0 }
  0xf5   : > { %v2916_v42 = vpop.f32.mrf.mxu0  ;;  %v3640_v44 = vsel %vm631_vm12, %v481_v28, 0.0  ;;  %v3686_v27 = vsel %vm638_vm4, %v516_v47, 0.0  ;;  %v3688_v28 = vsel %vm639_vm5, %v521_v57, 0.0  ;;  %v611_v29 = vand.u32 2147483647, %v541_v21  ;;  %v570_v32 = vpop.f32.mrf.mxu1 }
  0xf6   : > { %v601_v46 = vand.u32 2147483647, %v491_v41  ;;  %v506_v48 = vadd.f32 %v2916_v42, %v3566_v34  ;;  %v716_v51 = vsel %vm685_vm3, %v3640_v44, 0.0  ;;  %vm634_vm15 = vcmp.gt.f32.partialorder %v602_v40, 0.5 }
  0xf7   : > { %v500_v52 = vpop.f32.mrf.mxu0  ;;  %714 = vadd.xlane.f32.xlu1 %v713_v50  ;;  %717 = vadd.xlane.f32.xlu0 %v716_v51  ;;  %v3662_v58 = vsel %vm634_vm15, %v496_v33, 0.0  ;;  %v551_v20 = vadd.f32 %v3566_v34, %v550_v45  ;;  %vm640_vm6 = vcmp.gt.f32.partialorder %v608_v6, 0.5  ;;  %vm641_vm7 = vcmp.gt.f32.partialorder %v609_v18, 0.5  ;;  %v2940_v42 = vpop.f32.mrf.mxu1 }
  0xf8   : > { %v604_v59 = vand.u32 2147483647, %v506_v48  ;;  %v501_v61 = vadd.f32 %v3566_v34, %v500_v52  ;;  %vm633_vm14 = vcmp.gt.f32.partialorder %v601_v46, 0.5  ;;  %v725_v12 = vsel %vm685_vm3, %v3662_v58, 0.0 }
  0xf9   : > { %v3654_v62 = vsel %vm633_vm14, %v491_v41, 0.0  ;;  %v737_v33 = vsel %vm685_vm3, %v3686_v27, 0.0  ;;  %v740_v35 = vsel %vm685_vm3, %v3688_v28, 0.0  ;;  %v612_v36 = vand.u32 2147483647, %v546_v25  ;;  %v580_v54 = vpop.f32.mrf.mxu1 }
  0xfa   : > { %v603_v0 = vand.u32 2147483647, %v501_v61  ;;  %v722_v2 = vsel %vm685_vm3, %v3654_v62, 0.0  ;;  %vm636_vm2 = vcmp.gt.f32.partialorder %v604_v59, 0.5  ;;  %v556_v13 = vadd.f32 %v3628_v31, %v3566_v34 }
  0xfb   : > { %720 = vadd.xlane.f32.xlu1 %v719_v43  ;;  %723 = vadd.xlane.f32.xlu0 %v722_v2  ;;  %v3674_v16 = vsel %vm636_vm2, %v506_v48, 0.0  ;;  %v3697_v37 = vsel %vm640_vm6, %v526_v5, 0.0  ;;  %v3699_v39 = vsel %vm641_vm7, %v531_v9, 0.0  ;;  %v613_v40 = vand.u32 2147483647, %v551_v20 }
  0xfc   : > { %vm635_vm1 = vcmp.gt.f32.partialorder %v603_v0, 0.5  ;;  %v731_v23 = vsel %vm685_vm3, %v3674_v16, 0.0  ;;  %v561_v41 = vadd.f32 %v3566_v34, %v560_v11  ;;  %vm642_vm8 = vcmp.gt.f32.partialorder %v610_v24, 0.5 }
  0xfd   : > { %v3666_v10 = vsel %vm635_vm1, %v501_v61, 0.0  ;;  %vm643_vm9 = vcmp.gt.f32.partialorder %v611_v29, 0.5  ;;  %v743_v45 = vsel %vm685_vm3, %v3697_v37, 0.0  ;;  %v746_v46 = vsel %vm685_vm3, %v3699_v39, 0.0 }
  0xfe   : > { %v728_v53 = vsel %vm685_vm3, %v3666_v10, 0.0  ;;  %v614_v48 = vand.u32 2147483647, %v556_v13  ;;  %v566_v31 = vadd.f32 %v2934_v63, %v3566_v34  ;;  %v3707_v50 = vsel %vm642_vm8, %v536_v14, 0.0 }
  0xff   : > { %726 = vadd.xlane.f32.xlu1 %v725_v12  ;;  %729 = vadd.xlane.f32.xlu0 %v728_v53  ;;  %v3709_v51 = vsel %vm643_vm9, %v541_v21, 0.0  ;;  %v615_v52 = vand.u32 2147483647, %v561_v41  ;;  %v571_v47 = vadd.f32 %v3566_v34, %v570_v32  ;;  %vm644_vm10 = vcmp.gt.f32.partialorder %v612_v36, 0.5 }
 0x100   : > { %vm645_vm11 = vcmp.gt.f32.partialorder %v613_v40, 0.5  ;;  %v749_v57 = vsel %vm685_vm3, %v3707_v50, 0.0  ;;  %v752_v59 = vsel %vm685_vm3, %v3709_v51, 0.0  ;;  %v616_v61 = vand.u32 2147483647, %v566_v31 }
 0x101   : > { %v576_v63 = vadd.f32 %v2937_v22, %v3566_v34  ;;  %v3717_v0 = vsel %vm644_vm10, %v546_v25, 0.0  ;;  %v3719_v43 = vsel %vm645_vm11, %v551_v20, 0.0  ;;  %v617_v2 = vand.u32 2147483647, %v571_v47 }
 0x102   : > { %v581_v4 = vadd.f32 %v3566_v34, %v580_v54  ;;  %vm646_vm12 = vcmp.gt.f32.partialorder %v614_v48, 0.5  ;;  %vm647_vm13 = vcmp.gt.f32.partialorder %v615_v52, 0.5  ;;  %v755_v5 = vsel %vm685_vm3, %v3717_v0, 0.0 }
 0x103   : > { %732 = vadd.xlane.f32.xlu1 %v731_v23  ;;  %735 = vadd.xlane.f32.xlu0 %v734_v1  ;;  %v758_v7 = vsel %vm685_vm3, %v3719_v43, 0.0  ;;  %v618_v9 = vand.u32 2147483647, %v576_v63  ;;  %v3726_v11 = vsel %vm646_vm12, %v556_v13, 0.0  ;;  %v3728_v12 = vsel %vm647_vm13, %v561_v41, 0.0 }
 0x104   : > { %v586_v53 = vadd.f32 %v2940_v42, %v3566_v34  ;;  %v619_v14 = vand.u32 2147483647, %v581_v4  ;;  %vm648_vm14 = vcmp.gt.f32.partialorder %v616_v61, 0.5  ;;  %vm649_vm15 = vcmp.gt.f32.partialorder %v617_v2, 0.5 }
 0x105   : > { %v761_v6 = vsel %vm685_vm3, %v3726_v11, 0.0  ;;  %v764_v18 = vsel %vm685_vm3, %v3728_v12, 0.0  ;;  %v3735_v21 = vsel %vm648_vm14, %v566_v31, 0.0  ;;  %v3737_v22 = vsel %vm649_vm15, %v571_v47, 0.0 }
 0x106   : > { %v620_v23 = vand.u32 2147483647, %v586_v53  ;;  %vm650_vm0 = vcmp.gt.f32.partialorder %v618_v9, 0.5  ;;  %vm651_vm1 = vcmp.gt.f32.partialorder %v619_v14, 0.5  ;;  %v767_v34 = vsel %vm685_vm3, %v3735_v21, 0.0 }
 0x107   : > { %738 = vadd.xlane.f32.xlu1 %v737_v33  ;;  %741 = vadd.xlane.f32.xlu0 %v740_v35  ;;  %v770_v1 = vsel %vm685_vm3, %v3737_v22, 0.0  ;;  %v3743_v24 = vsel %vm650_vm0, %v576_v63, 0.0  ;;  %v3745_v25 = vsel %vm651_vm1, %v581_v4, 0.0  ;;  %v1104_v35 = vld [vmem:[%s4824_s2 + $0x8] sm:$0xf]  ;;  %vm1205_vm4 = vcmask 1043456  }
 0x108   : > { %vm652_vm2 = vcmp.gt.f32.partialorder %v620_v23, 0.5  ;;  %v773_v29 = vsel %vm685_vm3, %v3743_v24, 0.0  ;;  %v776_v20 = vsel %vm685_vm3, %v3745_v25, 0.0  ;;  %2941 = vmatprep.subr.msk.mxu1 %vm1205_vm4, %v1104_v35  ;;  %vm1530_vm5 = vcmask 48128  }
 0x109   : > { %v3751_v32 = vsel %vm652_vm2, %v586_v53, 0.0  ;;  %2942 = vmatpush3.msk.msra.mxu1 %vm1205_vm4, %v1104_v35 }
 0x10a   : > { %v779_v33 = vsel %vm685_vm3, %v3751_v32, 0.0 }
 0x10b   : > { %744 = vadd.xlane.f32.xlu1 %v743_v45  ;;  %747 = vadd.xlane.f32.xlu0 %v746_v46 }
 0x10f   : > { %750 = vadd.xlane.f32.xlu1 %v749_v57  ;;  %753 = vadd.xlane.f32.xlu0 %v752_v59 }
 0x113   : > { %756 = vadd.xlane.f32.xlu1 %v755_v5  ;;  %759 = vadd.xlane.f32.xlu0 %v758_v7 }
 0x117   : > { %762 = vadd.xlane.f32.xlu1 %v761_v6  ;;  %765 = vadd.xlane.f32.xlu0 %v764_v18 }
 0x11b   : > { %768 = vadd.xlane.f32.xlu1 %v767_v34  ;;  %771 = vadd.xlane.f32.xlu0 %v770_v1 }
 0x11f   : > { %774 = vadd.xlane.f32.xlu1 %v773_v29  ;;  %777 = vadd.xlane.f32.xlu0 %v776_v20 }
 0x123   : > { %780 = vadd.xlane.f32.xlu1 %v779_v33 }
 0x16c   : > { %v688_v36 = vpop.xlane.xlu0 %687 }
 0x16d   : > { %v783_v13 = vmul.f32 0.083333336, %v688_v36 }
 0x16f   : > { %v3759_v40 = vsub.f32 %v3576_v49, %v783_v13 }
 0x170   : > { %v694_v41 = vpop.xlane.xlu1 %693  ;;  %v691_v42 = vpop.xlane.xlu0 %690 }
 0x171   : > { %v785_v45 = vmul.f32 0.083333336, %v694_v41  ;;  %v784_v46 = vmul.f32 0.083333336, %v691_v42  ;;  %v847_v48 = vmul.f32 %v3759_v40, %v3759_v40 }
 0x173   : > { %v3764_v31 = vsub.f32 %v3588_v60, %v785_v45  ;;  %v3767_v52 = vsub.f32 %v3583_v55, %v784_v46  ;;  %v879_v47 = vsel %vm685_vm3, %v847_v48, 0.0 }
 0x174   : > { %v697_v54 = vpop.xlane.xlu1 %696  ;;  %880 = vadd.xlane.f32.xlu0 %v879_v47  ;;  %v700_v57 = vpop.xlane.xlu0 %699 }
 0x175   : > { %v786_v49 = vmul.f32 0.083333336, %v697_v54  ;;  %v787_v59 = vmul.f32 0.083333336, %v700_v57  ;;  %v849_v61 = vmul.f32 %v3764_v31, %v3764_v31  ;;  %v848_v63 = vmul.f32 %v3767_v52, %v3767_v52 }
 0x177   : > { %v3775_v2 = vsub.f32 %v3597_v3, %v786_v49  ;;  %v3778_v60 = vsub.f32 %v3602_v8, %v787_v59  ;;  %v885_v55 = vsel %vm685_vm3, %v849_v61, 0.0  ;;  %v882_v4 = vsel %vm685_vm3, %v848_v63, 0.0 }
 0x178   : > { %v703_v5 = vpop.xlane.xlu1 %702  ;;  %886 = vadd.xlane.f32.xlu0 %v885_v55  ;;  %883 = vadd.xlane.f32.xlu1 %v882_v4  ;;  %v706_v7 = vpop.xlane.xlu0 %705 }
 0x179   : > { %v788_v9 = vmul.f32 0.083333336, %v703_v5  ;;  %v789_v53 = vmul.f32 0.083333336, %v706_v7  ;;  %v850_v14 = vmul.f32 %v3775_v2, %v3775_v2  ;;  %v851_v3 = vmul.f32 %v3778_v60, %v3778_v60 }
 0x17b   : > { %v3787_v6 = vsub.f32 %v3611_v15, %v788_v9  ;;  %v3790_v8 = vsub.f32 %v3614_v19, %v789_v53  ;;  %v888_v18 = vsel %vm685_vm3, %v850_v14, 0.0  ;;  %v891_v23 = vsel %vm685_vm3, %v851_v3, 0.0 }
 0x17c   : > { %v709_v34 = vpop.xlane.xlu1 %708  ;;  %889 = vadd.xlane.f32.xlu1 %v888_v18  ;;  %892 = vadd.xlane.f32.xlu0 %v891_v23  ;;  %v712_v1 = vpop.xlane.xlu0 %711 }
 0x17d   : > { %v790_v29 = vmul.f32 0.083333336, %v709_v34  ;;  %v791_v20 = vmul.f32 0.083333336, %v712_v1  ;;  %v852_v33 = vmul.f32 %v3787_v6, %v3787_v6  ;;  %v853_v15 = vmul.f32 %v3790_v8, %v3790_v8 }
 0x17f   : > { %v3799_v35 = vsub.f32 %v3623_v26, %v790_v29  ;;  %v3802_v19 = vsub.f32 %v3626_v30, %v791_v20  ;;  %v894_v36 = vsel %vm685_vm3, %v852_v33, 0.0  ;;  %v897_v13 = vsel %vm685_vm3, %v853_v15, 0.0 }
 0x180   : > { %v715_v41 = vpop.xlane.xlu1 %714  ;;  %895 = vadd.xlane.f32.xlu1 %v894_v36  ;;  %898 = vadd.xlane.f32.xlu0 %v897_v13  ;;  %v718_v42 = vpop.xlane.xlu0 %717 }
 0x181   : > { %v792_v45 = vmul.f32 0.083333336, %v715_v41  ;;  %v793_v46 = vmul.f32 0.083333336, %v718_v42  ;;  %v854_v48 = vmul.f32 %v3799_v35, %v3799_v35  ;;  %v855_v26 = vmul.f32 %v3802_v19, %v3802_v19 }
 0x183   : > { %v3811_v47 = vsub.f32 %v3635_v38, %v792_v45  ;;  %v3814_v30 = vsub.f32 %v3640_v44, %v793_v46  ;;  %v900_v54 = vsel %vm685_vm3, %v854_v48, 0.0  ;;  %v903_v57 = vsel %vm685_vm3, %v855_v26, 0.0 }
 0x184   : > { %v721_v49 = vpop.xlane.xlu1 %720  ;;  %901 = vadd.xlane.f32.xlu1 %v900_v54  ;;  %904 = vadd.xlane.f32.xlu0 %v903_v57  ;;  %v724_v59 = vpop.xlane.xlu0 %723 }
 0x185   : > { %v794_v61 = vmul.f32 0.083333336, %v721_v49  ;;  %v795_v63 = vmul.f32 0.083333336, %v724_v59  ;;  %v856_v55 = vmul.f32 %v3811_v47, %v3811_v47  ;;  %v857_v38 = vmul.f32 %v3814_v30, %v3814_v30 }
 0x187   : > { %v3823_v4 = vsub.f32 %v3649_v56, %v794_v61  ;;  %v3826_v44 = vsub.f32 %v3654_v62, %v795_v63  ;;  %v906_v5 = vsel %vm685_vm3, %v856_v55, 0.0  ;;  %v909_v7 = vsel %vm685_vm3, %v857_v38, 0.0  ;;  %v1103_v55 = vld [vmem:[%s4824_s2] sm:$0xff] }
 0x188   : > { %v727_v9 = vpop.xlane.xlu1 %726  ;;  %907 = vadd.xlane.f32.xlu1 %v906_v5  ;;  %910 = vadd.xlane.f32.xlu0 %v909_v7  ;;  %v730_v53 = vpop.xlane.xlu0 %729 }
 0x189   : > { %v796_v14 = vmul.f32 0.083333336, %v727_v9  ;;  %v797_v3 = vmul.f32 0.083333336, %v730_v53  ;;  %v858_v18 = vmul.f32 %v3823_v4, %v3823_v4  ;;  %v859_v56 = vmul.f32 %v3826_v44, %v3826_v44  ;;  %2943 = vmatprep.subr.mxu1 %v1103_v55 }
 0x18a   : > { %2944 = vmatpush3.msra.mxu1 %v1103_v55 }
 0x18b   : > { %v3835_v23 = vsub.f32 %v3662_v58, %v796_v14  ;;  %v3838_v62 = vsub.f32 %v3666_v10, %v797_v3  ;;  %v912_v34 = vsel %vm685_vm3, %v858_v18, 0.0  ;;  %v915_v1 = vsel %vm685_vm3, %v859_v56, 0.0 }
 0x18c   : > { %v733_v29 = vpop.xlane.xlu1 %732  ;;  %913 = vadd.xlane.f32.xlu1 %v912_v34  ;;  %916 = vadd.xlane.f32.xlu0 %v915_v1  ;;  %v736_v20 = vpop.xlane.xlu0 %735 }
 0x18d   : > { %v798_v33 = vmul.f32 0.083333336, %v733_v29  ;;  %v799_v15 = vmul.f32 0.083333336, %v736_v20  ;;  %v860_v36 = vmul.f32 %v3835_v23, %v3835_v23  ;;  %v861_v58 = vmul.f32 %v3838_v62, %v3838_v62 }
 0x18f   : > { %v3847_v13 = vsub.f32 %v3674_v16, %v798_v33  ;;  %v3850_v10 = vsub.f32 %v3676_v17, %v799_v15  ;;  %v918_v41 = vsel %vm685_vm3, %v860_v36, 0.0  ;;  %v921_v42 = vsel %vm685_vm3, %v861_v58, 0.0 }
 0x190   : > { %v739_v45 = vpop.xlane.xlu1 %738  ;;  %919 = vadd.xlane.f32.xlu1 %v918_v41  ;;  %922 = vadd.xlane.f32.xlu0 %v921_v42  ;;  %v742_v46 = vpop.xlane.xlu0 %741 }
 0x191   : > { %v800_v48 = vmul.f32 0.083333336, %v739_v45  ;;  %v801_v26 = vmul.f32 0.083333336, %v742_v46  ;;  %v862_v54 = vmul.f32 %v3847_v13, %v3847_v13  ;;  %v863_v16 = vmul.f32 %v3850_v10, %v3850_v10 }
 0x193   : > { %v3859_v57 = vsub.f32 %v3686_v27, %v800_v48  ;;  %v3862_v17 = vsub.f32 %v3688_v28, %v801_v26  ;;  %v924_v49 = vsel %vm685_vm3, %v862_v54, 0.0  ;;  %v927_v59 = vsel %vm685_vm3, %v863_v16, 0.0 }
 0x194   : > { %v745_v61 = vpop.xlane.xlu1 %744  ;;  %925 = vadd.xlane.f32.xlu1 %v924_v49  ;;  %928 = vadd.xlane.f32.xlu0 %v927_v59  ;;  %v748_v63 = vpop.xlane.xlu0 %747 }
 0x195   : > { %v802_v38 = vmul.f32 0.083333336, %v745_v61  ;;  %v803_v5 = vmul.f32 0.083333336, %v748_v63  ;;  %v864_v27 = vmul.f32 %v3859_v57, %v3859_v57  ;;  %v865_v28 = vmul.f32 %v3862_v17, %v3862_v17 }
 0x197   : > { %v3874_v7 = vsub.f32 %v3697_v37, %v802_v38  ;;  %v3877_v9 = vsub.f32 %v3699_v39, %v803_v5  ;;  %v930_v53 = vsel %vm685_vm3, %v864_v27, 0.0  ;;  %v933_v14 = vsel %vm685_vm3, %v865_v28, 0.0 }
 0x198   : > { %v751_v3 = vpop.xlane.xlu1 %750  ;;  %931 = vadd.xlane.f32.xlu1 %v930_v53  ;;  %934 = vadd.xlane.f32.xlu0 %v933_v14  ;;  %v754_v18 = vpop.xlane.xlu0 %753 }
 0x199   : > { %v804_v56 = vmul.f32 0.083333336, %v751_v3  ;;  %v805_v34 = vmul.f32 0.083333336, %v754_v18  ;;  %v866_v1 = vmul.f32 %v3874_v7, %v3874_v7  ;;  %v867_v37 = vmul.f32 %v3877_v9, %v3877_v9 }
 0x19b   : > { %v3886_v29 = vsub.f32 %v3707_v50, %v804_v56  ;;  %v3889_v39 = vsub.f32 %v3709_v51, %v805_v34  ;;  %v936_v20 = vsel %vm685_vm3, %v866_v1, 0.0  ;;  %v939_v33 = vsel %vm685_vm3, %v867_v37, 0.0 }
 0x19c   : > { %v757_v15 = vpop.xlane.xlu1 %756  ;;  %937 = vadd.xlane.f32.xlu1 %v936_v20  ;;  %940 = vadd.xlane.f32.xlu0 %v939_v33  ;;  %v760_v36 = vpop.xlane.xlu0 %759 }
 0x19d   : > { %v806_v58 = vmul.f32 0.083333336, %v757_v15  ;;  %v807_v41 = vmul.f32 0.083333336, %v760_v36  ;;  %v868_v42 = vmul.f32 %v3886_v29, %v3886_v29  ;;  %v869_v50 = vmul.f32 %v3889_v39, %v3889_v39 }
 0x19f   : > { %v3898_v45 = vsub.f32 %v3717_v0, %v806_v58  ;;  %v3901_v51 = vsub.f32 %v3719_v43, %v807_v41  ;;  %v942_v46 = vsel %vm685_vm3, %v868_v42, 0.0  ;;  %v945_v48 = vsel %vm685_vm3, %v869_v50, 0.0 }
 0x1a0   : > { %v763_v26 = vpop.xlane.xlu1 %762  ;;  %943 = vadd.xlane.f32.xlu1 %v942_v46  ;;  %946 = vadd.xlane.f32.xlu0 %v945_v48  ;;  %v766_v54 = vpop.xlane.xlu0 %765 }
 0x1a1   : > { %v808_v16 = vmul.f32 0.083333336, %v763_v26  ;;  %v809_v49 = vmul.f32 0.083333336, %v766_v54  ;;  %v870_v59 = vmul.f32 %v3898_v45, %v3898_v45  ;;  %v871_v0 = vmul.f32 %v3901_v51, %v3901_v51 }
 0x1a3   : > { %v3910_v61 = vsub.f32 %v3726_v11, %v808_v16  ;;  %v3913_v43 = vsub.f32 %v3728_v12, %v809_v49  ;;  %v948_v63 = vsel %vm685_vm3, %v870_v59, 0.0  ;;  %v951_v55 = vsel %vm685_vm3, %v871_v0, 0.0 }
 0x1a4   : > { %v769_v38 = vpop.xlane.xlu1 %768  ;;  %949 = vadd.xlane.f32.xlu1 %v948_v63  ;;  %952 = vadd.xlane.f32.xlu0 %v951_v55  ;;  %v772_v5 = vpop.xlane.xlu0 %771 }
 0x1a5   : > { %v810_v27 = vmul.f32 0.083333336, %v769_v38  ;;  %v811_v28 = vmul.f32 0.083333336, %v772_v5  ;;  %v872_v53 = vmul.f32 %v3910_v61, %v3910_v61  ;;  %v873_v11 = vmul.f32 %v3913_v43, %v3913_v43 }
 0x1a7   : > { %v3922_v14 = vsub.f32 %v3735_v21, %v810_v27  ;;  %v3925_v12 = vsub.f32 %v3737_v22, %v811_v28  ;;  %v954_v3 = vsel %vm685_vm3, %v872_v53, 0.0  ;;  %v957_v18 = vsel %vm685_vm3, %v873_v11, 0.0 }
 0x1a8   : > { %v775_v56 = vpop.xlane.xlu1 %774  ;;  %955 = vadd.xlane.f32.xlu1 %v954_v3  ;;  %958 = vadd.xlane.f32.xlu0 %v957_v18  ;;  %v778_v34 = vpop.xlane.xlu0 %777 }
 0x1a9   : > { %v812_v1 = vmul.f32 0.083333336, %v775_v56  ;;  %v813_v37 = vmul.f32 0.083333336, %v778_v34  ;;  %v874_v20 = vmul.f32 %v3922_v14, %v3922_v14  ;;  %v875_v21 = vmul.f32 %v3925_v12, %v3925_v12 }
 0x1ab   : > { %v3934_v33 = vsub.f32 %v3743_v24, %v812_v1  ;;  %v3937_v22 = vsub.f32 %v3745_v25, %v813_v37  ;;  %v960_v15 = vsel %vm685_vm3, %v874_v20, 0.0  ;;  %v963_v36 = vsel %vm685_vm3, %v875_v21, 0.0 }
 0x1ac   : > { %v781_v58 = vpop.xlane.xlu1 %780  ;;  %961 = vadd.xlane.f32.xlu1 %v960_v15  ;;  %964 = vadd.xlane.f32.xlu0 %v963_v36 }
 0x1ad   : > { %v814_v41 = vmul.f32 0.083333336, %v781_v58  ;;  %v876_v42 = vmul.f32 %v3934_v33, %v3934_v33  ;;  %v877_v50 = vmul.f32 %v3937_v22, %v3937_v22 }
 0x1af   : > { %v3946_v24 = vsub.f32 %v3751_v32, %v814_v41  ;;  %v966_v25 = vsel %vm685_vm3, %v876_v42, 0.0  ;;  %v969_v46 = vsel %vm685_vm3, %v877_v50, 0.0 }
 0x1b0   : > { %967 = vadd.xlane.f32.xlu1 %v966_v25  ;;  %970 = vadd.xlane.f32.xlu0 %v969_v46 }
 0x1b1   : > { %v878_v48 = vmul.f32 %v3946_v24, %v3946_v24 }
 0x1b3   : > { %v972_v26 = vsel %vm685_vm3, %v878_v48, 0.0 }
 0x1b4   : > { %973 = vadd.xlane.f32.xlu1 %v972_v26 }
 0x1fd   : > { %v881_v54 = vpop.xlane.xlu0 %880 }
 0x1fe   : > { %v975_v16 = vmul.f32 0.083333336, %v881_v54 }
 0x200   : > { %v1007_v49 = vadd.f32 1e-05, %v975_v16 }
 0x201   : > { %v884_v59 = vpop.xlane.xlu1 %883  ;;  %v887_v0 = vpop.xlane.xlu0 %886 }
 0x202   : > { %3088 = vrsqrt.f32 %v1007_v49  ;;  %v976_v32 = vmul.f32 0.083333336, %v884_v59  ;;  %v977_v63 = vmul.f32 0.083333336, %v887_v0 }
 0x204   : > { %v1008_v55 = vadd.f32 1e-05, %v976_v32  ;;  %v1009_v38 = vadd.f32 1e-05, %v977_v63 }
 0x205   : > { %v890_v5 = vpop.xlane.xlu1 %889  ;;  %v893_v27 = vpop.xlane.xlu0 %892 }
 0x206   : > { %3090 = vrsqrt.f32 %v1008_v55  ;;  %v978_v28 = vmul.f32 0.083333336, %v890_v5  ;;  %v979_v53 = vmul.f32 0.083333336, %v893_v27 }
 0x207   : > { %3092 = vrsqrt.f32 %v1009_v38 }
 0x208   : > { %v1010_v11 = vadd.f32 1e-05, %v978_v28  ;;  %v1011_v3 = vadd.f32 1e-05, %v979_v53 }
 0x209   : > { %v896_v18 = vpop.xlane.xlu1 %895  ;;  %v899_v56 = vpop.xlane.xlu0 %898 }
 0x20a   : > { %3094 = vrsqrt.f32 %v1010_v11  ;;  %v980_v34 = vmul.f32 0.083333336, %v896_v18  ;;  %v981_v1 = vmul.f32 0.083333336, %v899_v56 }
 0x20b   : > { %3096 = vrsqrt.f32 %v1011_v3 }
 0x20c   : > { %v1012_v37 = vadd.f32 1e-05, %v980_v34  ;;  %v1013_v20 = vadd.f32 1e-05, %v981_v1 }
 0x20d   : > { %v902_v21 = vpop.xlane.xlu1 %901  ;;  %v905_v15 = vpop.xlane.xlu0 %904 }
 0x20e   : > { %3098 = vrsqrt.f32 %v1012_v37  ;;  %v982_v36 = vmul.f32 0.083333336, %v902_v21  ;;  %v983_v58 = vmul.f32 0.083333336, %v905_v15 }
 0x20f   : > { %v3089_v41 = vpop.eup %3088  ;;  %3100 = vrsqrt.f32 %v1013_v20 }
 0x210   : > { %v1014_v42 = vadd.f32 1e-05, %v982_v36  ;;  %v1015_v50 = vadd.f32 1e-05, %v983_v58  ;;  %v1071_v25 = vmul.f32 %v3089_v41, %v3759_v40 }
 0x211   : > { %v908_v46 = vpop.xlane.xlu1 %907  ;;  %v911_v48 = vpop.xlane.xlu0 %910 }
 0x212   : > { %3102 = vrsqrt.f32 %v1014_v42  ;;  %v984_v26 = vmul.f32 0.083333336, %v908_v46  ;;  %v985_v54 = vmul.f32 0.083333336, %v911_v48  ;;  %2945 = vmatprep.mubr.msk.f32.mxu1 %vm685_vm3, %v1071_v25 }
 0x213   : > { %v3091_v16 = vpop.eup %3090  ;;  %3104 = vrsqrt.f32 %v1015_v50 }
 0x214   : > { %v3093_v49 = vpop.eup %3092  ;;  %v1072_v59 = vmul.f32 %v3091_v16, %v3767_v52  ;;  %v1016_v0 = vadd.f32 1e-05, %v984_v26  ;;  %v1017_v32 = vadd.f32 1e-05, %v985_v54 }
 0x215   : > { %v914_v63 = vpop.xlane.xlu1 %913  ;;  %v917_v55 = vpop.xlane.xlu0 %916  ;;  %v1073_v38 = vmul.f32 %v3093_v49, %v3764_v31 }
 0x216   : > { %3106 = vrsqrt.f32 %v1016_v0  ;;  %v986_v40 = vmul.f32 0.083333336, %v914_v63  ;;  %v987_v5 = vmul.f32 0.083333336, %v917_v55  ;;  %2946 = vmatmul.mubr.msk.f32.vlgmr.msra.gmra.mxu1 %vm685_vm3, %v1072_v59 }
 0x217   : > { %v3095_v27 = vpop.eup %3094  ;;  %3108 = vrsqrt.f32 %v1017_v32  ;;  %2948 = vmatprep.mubr.msk.f32.mxu1 %vm685_vm3, %v1073_v38 }
 0x218   : > { %v3097_v28 = vpop.eup %3096  ;;  %v1018_v53 = vadd.f32 1e-05, %v986_v40  ;;  %v1019_v11 = vadd.f32 1e-05, %v987_v5  ;;  %v1074_v52 = vmul.f32 %v3095_v27, %v3775_v2 }
 0x219   : > { %v920_v3 = vpop.xlane.xlu1 %919  ;;  %v923_v18 = vpop.xlane.xlu0 %922  ;;  %v1075_v56 = vmul.f32 %v3097_v28, %v3778_v60 }
 0x21a   : > { %3110 = vrsqrt.f32 %v1018_v53  ;;  %v988_v31 = vmul.f32 0.083333336, %v920_v3  ;;  %v989_v34 = vmul.f32 0.083333336, %v923_v18  ;;  %2949 = vmatmul.mubr.msk.f32.gmra.mxu1 %vm685_vm3, %v1074_v52 }
 0x21b   : > { %v3099_v1 = vpop.eup %3098  ;;  %3112 = vrsqrt.f32 %v1019_v11  ;;  %2951 = vmatprep.mubr.msk.f32.mxu1 %vm685_vm3, %v1075_v56 }
 0x21c   : > { %v3101_v37 = vpop.eup %3100  ;;  %v1020_v20 = vadd.f32 1e-05, %v988_v31  ;;  %v1021_v21 = vadd.f32 1e-05, %v989_v34  ;;  %v1076_v15 = vmul.f32 %v3099_v1, %v3787_v6 }
 0x21d   : > { %v926_v36 = vpop.xlane.xlu1 %925  ;;  %v929_v2 = vpop.xlane.xlu0 %928  ;;  %v1077_v58 = vmul.f32 %v3101_v37, %v3790_v8 }
 0x21e   : > { %3114 = vrsqrt.f32 %v1020_v20  ;;  %v990_v60 = vmul.f32 0.083333336, %v926_v36  ;;  %v991_v41 = vmul.f32 0.083333336, %v929_v2  ;;  %2952 = vmatmul.mubr.msk.f32.gmra.mxu1 %vm685_vm3, %v1076_v15 }
 0x21f   : > { %v3103_v42 = vpop.eup %3102  ;;  %3116 = vrsqrt.f32 %v1021_v21  ;;  %2954 = vmatprep.mubr.msk.f32.mxu1 %vm685_vm3, %v1077_v58 }
 0x220   : > { %v3105_v50 = vpop.eup %3104  ;;  %v1022_v25 = vadd.f32 1e-05, %v990_v60  ;;  %v1023_v46 = vadd.f32 1e-05, %v991_v41  ;;  %v1078_v48 = vmul.f32 %v3103_v42, %v3799_v35 }
 0x221   : > { %v932_v26 = vpop.xlane.xlu1 %931  ;;  %v935_v6 = vpop.xlane.xlu0 %934  ;;  %v1079_v54 = vmul.f32 %v3105_v50, %v3802_v19 }
 0x222   : > { %3118 = vrsqrt.f32 %v1022_v25  ;;  %v992_v8 = vmul.f32 0.083333336, %v932_v26  ;;  %v993_v16 = vmul.f32 0.083333336, %v935_v6  ;;  %2955 = vmatmul.mubr.msk.f32.gmra.mxu1 %vm685_vm3, %v1078_v48 }
 0x223   : > { %v3107_v49 = vpop.eup %3106  ;;  %3120 = vrsqrt.f32 %v1023_v46  ;;  %2957 = vmatprep.mubr.msk.f32.mxu1 %vm685_vm3, %v1079_v54 }
 0x224   : > { %v3109_v59 = vpop.eup %3108  ;;  %v1024_v0 = vadd.f32 1e-05, %v992_v8  ;;  %v1025_v32 = vadd.f32 1e-05, %v993_v16  ;;  %v1080_v63 = vmul.f32 %v3107_v49, %v3811_v47 }
 0x225   : > { %v938_v55 = vpop.xlane.xlu1 %937  ;;  %v941_v35 = vpop.xlane.xlu0 %940  ;;  %v1081_v38 = vmul.f32 %v3109_v59, %v3814_v30 }
 0x226   : > { %3122 = vrsqrt.f32 %v1024_v0  ;;  %v994_v19 = vmul.f32 0.083333336, %v938_v55  ;;  %v995_v40 = vmul.f32 0.083333336, %v941_v35  ;;  %2958 = vmatmul.mubr.msk.f32.gmra.mxu1 %vm685_vm3, %v1080_v63 }
 0x227   : > { %v3111_v5 = vpop.eup %3110  ;;  %3124 = vrsqrt.f32 %v1025_v32  ;;  %2960 = vmatprep.mubr.msk.f32.mxu1 %vm685_vm3, %v1081_v38 }
 0x228   : > { %v3113_v27 = vpop.eup %3112  ;;  %v1026_v28 = vadd.f32 1e-05, %v994_v19  ;;  %v1027_v53 = vadd.f32 1e-05, %v995_v40  ;;  %v1082_v11 = vmul.f32 %v3111_v5, %v3823_v4 }
 0x229   : > { %v944_v52 = vpop.xlane.xlu1 %943  ;;  %v947_v47 = vpop.xlane.xlu0 %946  ;;  %v1083_v3 = vmul.f32 %v3113_v27, %v3826_v44 }
 0x22a   : > { %3126 = vrsqrt.f32 %v1026_v28  ;;  %v996_v30 = vmul.f32 0.083333336, %v944_v52  ;;  %v997_v18 = vmul.f32 0.083333336, %v947_v47  ;;  %2961 = vmatmul.mubr.msk.f32.gmra.mxu1 %vm685_vm3, %v1082_v11 }
 0x22b   : > { %v3115_v56 = vpop.eup %3114  ;;  %3128 = vrsqrt.f32 %v1027_v53  ;;  %2963 = vmatprep.mubr.msk.f32.mxu1 %vm685_vm3, %v1083_v3 }
 0x22c   : > { %v3117_v31 = vpop.eup %3116  ;;  %v1028_v34 = vadd.f32 1e-05, %v996_v30  ;;  %v1029_v1 = vadd.f32 1e-05, %v997_v18  ;;  %v1084_v37 = vmul.f32 %v3115_v56, %v3835_v23 }
 0x22d   : > { %v950_v20 = vpop.xlane.xlu1 %949  ;;  %v953_v4 = vpop.xlane.xlu0 %952  ;;  %v1085_v21 = vmul.f32 %v3117_v31, %v3838_v62 }
 0x22e   : > { %3130 = vrsqrt.f32 %v1028_v34  ;;  %v998_v44 = vmul.f32 0.083333336, %v950_v20  ;;  %v999_v15 = vmul.f32 0.083333336, %v953_v4  ;;  %2964 = vmatmul.mubr.msk.f32.gmra.mxu1 %vm685_vm3, %v1084_v37 }
 0x22f   : > { %v3119_v36 = vpop.eup %3118  ;;  %3132 = vrsqrt.f32 %v1029_v1  ;;  %2966 = vmatprep.mubr.msk.f32.mxu1 %vm685_vm3, %v1085_v21 }
 0x230   : > { %v3121_v2 = vpop.eup %3120  ;;  %v1030_v58 = vadd.f32 1e-05, %v998_v44  ;;  %v1031_v60 = vadd.f32 1e-05, %v999_v15  ;;  %v1086_v41 = vmul.f32 %v3119_v36, %v3847_v13 }
 0x231   : > { %v956_v42 = vpop.xlane.xlu1 %955  ;;  %v959_v23 = vpop.xlane.xlu0 %958  ;;  %v1087_v50 = vmul.f32 %v3121_v2, %v3850_v10 }
 0x232   : > { %3134 = vrsqrt.f32 %v1030_v58  ;;  %v1000_v62 = vmul.f32 0.083333336, %v956_v42  ;;  %v1001_v25 = vmul.f32 0.083333336, %v959_v23  ;;  %2967 = vmatmul.mubr.msk.f32.gmra.mxu1 %vm685_vm3, %v1086_v41 }
 0x233   : > { %v3123_v46 = vpop.eup %3122  ;;  %3136 = vrsqrt.f32 %v1031_v60  ;;  %2969 = vmatprep.mubr.msk.f32.mxu1 %vm685_vm3, %v1087_v50 }
 0x234   : > { %v3125_v48 = vpop.eup %3124  ;;  %v1032_v26 = vadd.f32 1e-05, %v1000_v62  ;;  %v1033_v6 = vadd.f32 1e-05, %v1001_v25  ;;  %v1088_v54 = vmul.f32 %v3123_v46, %v3859_v57 }
 0x235   : > { %v962_v8 = vpop.xlane.xlu1 %961  ;;  %v965_v13 = vpop.xlane.xlu0 %964  ;;  %v1089_v16 = vmul.f32 %v3125_v48, %v3862_v17 }
 0x236   : > { %3138 = vrsqrt.f32 %v1032_v26  ;;  %v1002_v10 = vmul.f32 0.083333336, %v962_v8  ;;  %v1003_v49 = vmul.f32 0.083333336, %v965_v13  ;;  %2970 = vmatmul.mubr.msk.f32.gmra.mxu1 %vm685_vm3, %v1088_v54 }
 0x237   : > { %v3127_v59 = vpop.eup %3126  ;;  %3140 = vrsqrt.f32 %v1033_v6  ;;  %2972 = vmatprep.mubr.msk.f32.mxu1 %vm685_vm3, %v1089_v16 }
 0x238   : > { %v3129_v0 = vpop.eup %3128  ;;  %v1034_v32 = vadd.f32 1e-05, %v1002_v10  ;;  %v1035_v63 = vadd.f32 1e-05, %v1003_v49  ;;  %v1090_v55 = vmul.f32 %v3127_v59, %v3874_v7 }
 0x239   : > { %v968_v35 = vpop.xlane.xlu1 %967  ;;  %v971_v57 = vpop.xlane.xlu0 %970  ;;  %v1091_v38 = vmul.f32 %v3129_v0, %v3877_v9 }
 0x23a   : > { %3142 = vrsqrt.f32 %v1034_v32  ;;  %v1004_v17 = vmul.f32 0.083333336, %v968_v35  ;;  %v1005_v19 = vmul.f32 0.083333336, %v971_v57  ;;  %2973 = vmatmul.mubr.msk.f32.gmra.mxu1 %vm685_vm3, %v1090_v55 }
 0x23b   : > { %v3131_v40 = vpop.eup %3130  ;;  %3144 = vrsqrt.f32 %v1035_v63  ;;  %2975 = vmatprep.mubr.msk.f32.mxu1 %vm685_vm3, %v1091_v38 }
 0x23c   : > { %v3133_v5 = vpop.eup %3132  ;;  %v1036_v27 = vadd.f32 1e-05, %v1004_v17  ;;  %v1037_v28 = vadd.f32 1e-05, %v1005_v19  ;;  %v1092_v53 = vmul.f32 %v3131_v40, %v3886_v29 }
 0x23d   : > { %v974_v11 = vpop.xlane.xlu1 %973  ;;  %v1093_v7 = vmul.f32 %v3133_v5, %v3889_v39 }
 0x23e   : > { %3146 = vrsqrt.f32 %v1036_v27  ;;  %v1006_v52 = vmul.f32 0.083333336, %v974_v11  ;;  %2976 = vmatmul.mubr.msk.f32.gmra.mxu1 %vm685_vm3, %v1092_v53 }
 0x23f   : > { %v3135_v9 = vpop.eup %3134  ;;  %3148 = vrsqrt.f32 %v1037_v28  ;;  %2978 = vmatprep.mubr.msk.f32.mxu1 %vm685_vm3, %v1093_v7 }
 0x240   : > { %v3137_v47 = vpop.eup %3136  ;;  %v1038_v3 = vadd.f32 1e-05, %v1006_v52  ;;  %v1094_v30 = vmul.f32 %v3135_v9, %v3898_v45 }
 0x241   : > { %v1095_v18 = vmul.f32 %v3137_v47, %v3901_v51 }
 0x242   : > { %3150 = vrsqrt.f32 %v1038_v3  ;;  %2979 = vmatmul.mubr.msk.f32.gmra.mxu1 %vm685_vm3, %v1094_v30 }
 0x243   : > { %v3139_v29 = vpop.eup %3138  ;;  %2981 = vmatprep.mubr.msk.f32.mxu1 %vm685_vm3, %v1095_v18 }
 0x244   : > { %v3141_v39 = vpop.eup %3140  ;;  %v1096_v56 = vmul.f32 %v3139_v29, %v3910_v61 }
 0x245   : > { %v1097_v31 = vmul.f32 %v3141_v39, %v3913_v43 }
 0x246   : > { %2982 = vmatmul.mubr.msk.f32.gmra.mxu1 %vm685_vm3, %v1096_v56 }
 0x247   : > { %v3143_v34 = vpop.eup %3142  ;;  %2984 = vmatprep.mubr.msk.f32.mxu1 %vm685_vm3, %v1097_v31 }
 0x248   : > { %v3145_v1 = vpop.eup %3144  ;;  %v1098_v45 = vmul.f32 %v3143_v34, %v3922_v14  ;;  %v4020_v14 = vld [vmem:[%s4826_s4 + $0x1] ss:$0 sm:$0xff] }
 0x249   : > { %v1099_v51 = vmul.f32 %v3145_v1, %v3925_v12 }
 0x24a   : > { %2985 = vmatmul.mubr.msk.f32.gmra.mxu1 %vm685_vm3, %v1098_v45 }
 0x24b   : > { %v3147_v37 = vpop.eup %3146  ;;  %2987 = vmatprep.mubr.msk.f32.mxu1 %vm685_vm3, %v1099_v51 }
 0x24c   : > { %v3149_v20 = vpop.eup %3148  ;;  %v1100_v61 = vmul.f32 %v3147_v37, %v3934_v33 }
 0x24d   : > { %v1101_v43 = vmul.f32 %v3149_v20, %v3937_v22 }
 0x24e   : > { %2988 = vmatmul.mubr.msk.f32.gmra.mxu1 %vm685_vm3, %v1100_v61 }
 0x24f   : > { %v3151_v4 = vpop.eup %3150  ;;  %2990 = vmatprep.mubr.msk.f32.mxu1 %vm685_vm3, %v1101_v43 }
 0x250   : > { %v1102_v21 = vmul.f32 %v3151_v4, %v3946_v24 }
 0x252   : > { %2991 = vmatmul.mubr.msk.f32.gmra.mxu1 %vm685_vm3, %v1102_v21 }
 0x2d6   : > { %v2947_v12 = vpop.f32.mrf.mxu1 }
 0x2d7   : > { %v1281_v44 = vadd.f32 %v2947_v12, %v4020_v14 }
 0x2d8   : > { %v1275_v33 = vpop.f32.mrf.mxu1 }
 0x2d9   : > { %v1435_v15 = vand.u32 2147483647, %v1281_v44  ;;  %v1276_v22 = vadd.f32 %v4020_v14, %v1275_v33 }
 0x2da   : > { %v2950_v36 = vpop.f32.mrf.mxu1 }
 0x2db   : > { %v1434_v2 = vand.u32 2147483647, %v1276_v22  ;;  %v1291_v58 = vadd.f32 %v2950_v36, %v4020_v14  ;;  %vm1467_vm6 = vcmp.gt.f32.partialorder %v1435_v15, 0.5 }
 0x2dc   : > { %v1285_v24 = vpop.f32.mrf.mxu1  ;;  %v4025_v60 = vsel %vm1467_vm6, %v1281_v44, 0.0 }
 0x2dd   : > { %v1437_v41 = vand.u32 2147483647, %v1291_v58  ;;  %v1286_v42 = vadd.f32 %v4020_v14, %v1285_v24  ;;  %v1534_v23 = vsel %vm1530_vm5, %v4025_v60, 0.0  ;;  %vm1466_vm3 = vcmp.gt.f32.partialorder %v1434_v2, 0.5 }
 0x2de   : > { %1535 = vadd.xlane.f32.xlu1 %v1534_v23  ;;  %v2953_v50 = vpop.f32.mrf.mxu1  ;;  %v4030_v62 = vsel %vm1466_vm3, %v1276_v22, 0.0 }
 0x2df   : > { %v1436_v25 = vand.u32 2147483647, %v1286_v42  ;;  %v1301_v46 = vadd.f32 %v2953_v50, %v4020_v14  ;;  %v1531_v48 = vsel %vm1530_vm5, %v4030_v62, 0.0  ;;  %vm1469_vm7 = vcmp.gt.f32.partialorder %v1437_v41, 0.5 }
 0x2e0   : > { %1532 = vadd.xlane.f32.xlu0 %v1531_v48  ;;  %v1295_v26 = vpop.f32.mrf.mxu1  ;;  %v4035_v6 = vsel %vm1469_vm7, %v1291_v58, 0.0 }
 0x2e1   : > { %v1439_v54 = vand.u32 2147483647, %v1301_v46  ;;  %v1296_v8 = vadd.f32 %v4020_v14, %v1295_v26  ;;  %v1540_v13 = vsel %vm1530_vm5, %v4035_v6, 0.0  ;;  %vm1468_vm8 = vcmp.gt.f32.partialorder %v1436_v25, 0.5 }
 0x2e2   : > { %1541 = vadd.xlane.f32.xlu1 %v1540_v13  ;;  %v2956_v16 = vpop.f32.mrf.mxu1  ;;  %v4040_v10 = vsel %vm1468_vm8, %v1286_v42, 0.0 }
 0x2e3   : > { %v1438_v49 = vand.u32 2147483647, %v1296_v8  ;;  %v1311_v59 = vadd.f32 %v2956_v16, %v4020_v14  ;;  %v1537_v0 = vsel %vm1530_vm5, %v4040_v10, 0.0  ;;  %vm1471_vm9 = vcmp.gt.f32.partialorder %v1439_v54, 0.5 }
 0x2e4   : > { %1538 = vadd.xlane.f32.xlu0 %v1537_v0  ;;  %v1305_v32 = vpop.f32.mrf.mxu1  ;;  %v4045_v63 = vsel %vm1471_vm9, %v1301_v46, 0.0 }
 0x2e5   : > { %v1441_v55 = vand.u32 2147483647, %v1311_v59  ;;  %v1306_v35 = vadd.f32 %v4020_v14, %v1305_v32  ;;  %v1546_v57 = vsel %vm1530_vm5, %v4045_v63, 0.0  ;;  %vm1470_vm10 = vcmp.gt.f32.partialorder %v1438_v49, 0.5 }
 0x2e6   : > { %1547 = vadd.xlane.f32.xlu1 %v1546_v57  ;;  %v2959_v38 = vpop.f32.mrf.mxu1  ;;  %v4050_v17 = vsel %vm1470_vm10, %v1296_v8, 0.0 }
 0x2e7   : > { %v1440_v19 = vand.u32 2147483647, %v1306_v35  ;;  %v1321_v40 = vadd.f32 %v2959_v38, %v4020_v14  ;;  %v1543_v5 = vsel %vm1530_vm5, %v4050_v17, 0.0  ;;  %vm1473_vm11 = vcmp.gt.f32.partialorder %v1441_v55, 0.5 }
 0x2e8   : > { %1544 = vadd.xlane.f32.xlu0 %v1543_v5  ;;  %v1315_v27 = vpop.f32.mrf.mxu1  ;;  %v4055_v28 = vsel %vm1473_vm11, %v1311_v59, 0.0 }
 0x2e9   : > { %v1443_v53 = vand.u32 2147483647, %v1321_v40  ;;  %v1316_v11 = vadd.f32 %v4020_v14, %v1315_v27  ;;  %v1552_v7 = vsel %vm1530_vm5, %v4055_v28, 0.0  ;;  %vm1472_vm12 = vcmp.gt.f32.partialorder %v1440_v19, 0.5 }
 0x2ea   : > { %1553 = vadd.xlane.f32.xlu1 %v1552_v7  ;;  %v2962_v52 = vpop.f32.mrf.mxu1  ;;  %v4060_v9 = vsel %vm1472_vm12, %v1306_v35, 0.0 }
 0x2eb   : > { %v1442_v47 = vand.u32 2147483647, %v1316_v11  ;;  %v1331_v3 = vadd.f32 %v2962_v52, %v4020_v14  ;;  %v1549_v30 = vsel %vm1530_vm5, %v4060_v9, 0.0  ;;  %vm1475_vm13 = vcmp.gt.f32.partialorder %v1443_v53, 0.5 }
 0x2ec   : > { %1550 = vadd.xlane.f32.xlu0 %v1549_v30  ;;  %v1325_v18 = vpop.f32.mrf.mxu1  ;;  %v4065_v29 = vsel %vm1475_vm13, %v1321_v40, 0.0 }
 0x2ed   : > { %v1445_v39 = vand.u32 2147483647, %v1331_v3  ;;  %v1326_v56 = vadd.f32 %v4020_v14, %v1325_v18  ;;  %v1558_v31 = vsel %vm1530_vm5, %v4065_v29, 0.0  ;;  %vm1474_vm14 = vcmp.gt.f32.partialorder %v1442_v47, 0.5 }
 0x2ee   : > { %1559 = vadd.xlane.f32.xlu1 %v1558_v31  ;;  %v2965_v34 = vpop.f32.mrf.mxu1  ;;  %v4070_v1 = vsel %vm1474_vm14, %v1316_v11, 0.0 }
 0x2ef   : > { %v1444_v45 = vand.u32 2147483647, %v1326_v56  ;;  %v1341_v51 = vadd.f32 %v2965_v34, %v4020_v14  ;;  %v1555_v37 = vsel %vm1530_vm5, %v4070_v1, 0.0  ;;  %vm1477_vm15 = vcmp.gt.f32.partialorder %v1445_v39, 0.5 }
 0x2f0   : > { %1556 = vadd.xlane.f32.xlu0 %v1555_v37  ;;  %v1335_v20 = vpop.f32.mrf.mxu1  ;;  %v4075_v61 = vsel %vm1477_vm15, %v1331_v3, 0.0 }
 0x2f1   : > { %v1447_v43 = vand.u32 2147483647, %v1341_v51  ;;  %v1336_v4 = vadd.f32 %v4020_v14, %v1335_v20  ;;  %v1564_v21 = vsel %vm1530_vm5, %v4075_v61, 0.0  ;;  %vm1476_vm0 = vcmp.gt.f32.partialorder %v1444_v45, 0.5 }
 0x2f2   : > { %1565 = vadd.xlane.f32.xlu1 %v1564_v21  ;;  %v2968_v12 = vpop.f32.mrf.mxu1  ;;  %v4080_v44 = vsel %vm1476_vm0, %v1326_v56, 0.0 }
 0x2f3   : > { %v1446_v33 = vand.u32 2147483647, %v1336_v4  ;;  %v1351_v15 = vadd.f32 %v2968_v12, %v4020_v14  ;;  %v1561_v22 = vsel %vm1530_vm5, %v4080_v44, 0.0  ;;  %vm1479_vm1 = vcmp.gt.f32.partialorder %v1447_v43, 0.5 }
 0x2f4   : > { %1562 = vadd.xlane.f32.xlu0 %v1561_v22  ;;  %v1345_v36 = vpop.f32.mrf.mxu1  ;;  %v4085_v2 = vsel %vm1479_vm1, %v1341_v51, 0.0 }
 0x2f5   : > { %v1449_v58 = vand.u32 2147483647, %v1351_v15  ;;  %v1346_v24 = vadd.f32 %v4020_v14, %v1345_v36  ;;  %v1570_v41 = vsel %vm1530_vm5, %v4085_v2, 0.0  ;;  %vm1478_vm2 = vcmp.gt.f32.partialorder %v1446_v33, 0.5 }
 0x2f6   : > { %1571 = vadd.xlane.f32.xlu1 %v1570_v41  ;;  %v2971_v42 = vpop.f32.mrf.mxu1  ;;  %v4090_v23 = vsel %vm1478_vm2, %v1336_v4, 0.0 }
 0x2f7   : > { %v1448_v50 = vand.u32 2147483647, %v1346_v24  ;;  %v1361_v25 = vadd.f32 %v2971_v42, %v4020_v14  ;;  %v1567_v46 = vsel %vm1530_vm5, %v4090_v23, 0.0  ;;  %vm1481_vm4 = vcmp.gt.f32.partialorder %v1449_v58, 0.5 }
 0x2f8   : > { %1568 = vadd.xlane.f32.xlu0 %v1567_v46  ;;  %v1355_v48 = vpop.f32.mrf.mxu1  ;;  %v4095_v26 = vsel %vm1481_vm4, %v1351_v15, 0.0 }
 0x2f9   : > { %v1451_v54 = vand.u32 2147483647, %v1361_v25  ;;  %v1356_v8 = vadd.f32 %v4020_v14, %v1355_v48  ;;  %v1576_v13 = vsel %vm1530_vm5, %v4095_v26, 0.0  ;;  %vm1480_vm6 = vcmp.gt.f32.partialorder %v1448_v50, 0.5 }
 0x2fa   : > { %1577 = vadd.xlane.f32.xlu1 %v1576_v13  ;;  %v2974_v16 = vpop.f32.mrf.mxu1  ;;  %v4100_v49 = vsel %vm1480_vm6, %v1346_v24, 0.0 }
 0x2fb   : > { %v1450_v59 = vand.u32 2147483647, %v1356_v8  ;;  %v1371_v0 = vadd.f32 %v2974_v16, %v4020_v14  ;;  %v1573_v32 = vsel %vm1530_vm5, %v4100_v49, 0.0  ;;  %vm1483_vm3 = vcmp.gt.f32.partialorder %v1451_v54, 0.5 }
 0x2fc   : > { %1574 = vadd.xlane.f32.xlu0 %v1573_v32  ;;  %v1365_v55 = vpop.f32.mrf.mxu1  ;;  %v4105_v35 = vsel %vm1483_vm3, %v1361_v25, 0.0 }
 0x2fd   : > { %v1453_v57 = vand.u32 2147483647, %v1371_v0  ;;  %v1366_v38 = vadd.f32 %v4020_v14, %v1365_v55  ;;  %v1582_v19 = vsel %vm1530_vm5, %v4105_v35, 0.0  ;;  %vm1482_vm7 = vcmp.gt.f32.partialorder %v1450_v59, 0.5 }
 0x2fe   : > { %1583 = vadd.xlane.f32.xlu1 %v1582_v19  ;;  %v2977_v40 = vpop.f32.mrf.mxu1  ;;  %v4110_v5 = vsel %vm1482_vm7, %v1356_v8, 0.0  ;;  %vm2049_vm7 = vcmask 1045504  }
 0x2ff   : > { %v1452_v27 = vand.u32 2147483647, %v1366_v38  ;;  %v1381_v53 = vadd.f32 %v2977_v40, %v4020_v14  ;;  %v1579_v11 = vsel %vm1530_vm5, %v4110_v5, 0.0  ;;  %vm1485_vm8 = vcmp.gt.f32.partialorder %v1453_v57, 0.5 }
 0x300   : > { %1580 = vadd.xlane.f32.xlu0 %v1579_v11  ;;  %v1375_v7 = vpop.f32.mrf.mxu1  ;;  %v4115_v52 = vsel %vm1485_vm8, %v1371_v0, 0.0 }
 0x301   : > { %v1455_v47 = vand.u32 2147483647, %v1381_v53  ;;  %v1376_v3 = vadd.f32 %v4020_v14, %v1375_v7  ;;  %v1588_v30 = vsel %vm1530_vm5, %v4115_v52, 0.0  ;;  %vm1484_vm9 = vcmp.gt.f32.partialorder %v1452_v27, 0.5 }
 0x302   : > { %1589 = vadd.xlane.f32.xlu1 %v1588_v30  ;;  %v2980_v18 = vpop.f32.mrf.mxu1  ;;  %v4120_v39 = vsel %vm1484_vm9, %v1366_v38, 0.0 }
 0x303   : > { %v1454_v56 = vand.u32 2147483647, %v1376_v3  ;;  %v1391_v31 = vadd.f32 %v2980_v18, %v4020_v14  ;;  %v1585_v34 = vsel %vm1530_vm5, %v4120_v39, 0.0  ;;  %vm1487_vm10 = vcmp.gt.f32.partialorder %v1455_v47, 0.5 }
 0x304   : > { %1586 = vadd.xlane.f32.xlu0 %v1585_v34  ;;  %v1385_v45 = vpop.f32.mrf.mxu1  ;;  %v4125_v51 = vsel %vm1487_vm10, %v1381_v53, 0.0 }
 0x305   : > { %v1457_v37 = vand.u32 2147483647, %v1391_v31  ;;  %v1386_v20 = vadd.f32 %v4020_v14, %v1385_v45  ;;  %v1594_v43 = vsel %vm1530_vm5, %v4125_v51, 0.0  ;;  %vm1486_vm11 = vcmp.gt.f32.partialorder %v1454_v56, 0.5 }
 0x306   : > { %1595 = vadd.xlane.f32.xlu1 %v1594_v43  ;;  %v2983_v4 = vpop.f32.mrf.mxu1  ;;  %v4130_v21 = vsel %vm1486_vm11, %v1376_v3, 0.0 }
 0x307   : > { %v1456_v12 = vand.u32 2147483647, %v1386_v20  ;;  %v1401_v33 = vadd.f32 %v2983_v4, %v4020_v14  ;;  %v1591_v15 = vsel %vm1530_vm5, %v4130_v21, 0.0  ;;  %vm1489_vm12 = vcmp.gt.f32.partialorder %v1457_v37, 0.5 }
 0x308   : > { %1592 = vadd.xlane.f32.xlu0 %v1591_v15  ;;  %v1395_v22 = vpop.f32.mrf.mxu1  ;;  %v4135_v36 = vsel %vm1489_vm12, %v1391_v31, 0.0 }
 0x309   : > { %v1459_v58 = vand.u32 2147483647, %v1401_v33  ;;  %v1396_v24 = vadd.f32 %v4020_v14, %v1395_v22  ;;  %v1600_v41 = vsel %vm1530_vm5, %v4135_v36, 0.0  ;;  %vm1488_vm13 = vcmp.gt.f32.partialorder %v1456_v12, 0.5  ;;  %v1948_v22 = vld [vmem:[%s4825_s3] sm:$0x3f] }
 0x30a   : > { %1601 = vadd.xlane.f32.xlu1 %v1600_v41  ;;  %v2986_v42 = vpop.f32.mrf.mxu1  ;;  %v4140_v50 = vsel %vm1488_vm13, %v1386_v20, 0.0  ;;  %2993 = vmatprep.subr.msk.mxu0 %vm2049_vm7, %v1948_v22 }
 0x30b   : > { %v1458_v25 = vand.u32 2147483647, %v1396_v24  ;;  %v1411_v46 = vadd.f32 %v2986_v42, %v4020_v14  ;;  %v1597_v48 = vsel %vm1530_vm5, %v4140_v50, 0.0  ;;  %vm1491_vm14 = vcmp.gt.f32.partialorder %v1459_v58, 0.5  ;;  %2994 = vmatpush3.msk.msra.mxu0 %vm2049_vm7, %v1948_v22 }
 0x30c   : > { %1598 = vadd.xlane.f32.xlu0 %v1597_v48  ;;  %v1405_v54 = vpop.f32.mrf.mxu1  ;;  %v4145_v8 = vsel %vm1491_vm14, %v1401_v33, 0.0 }
 0x30d   : > { %v1461_v13 = vand.u32 2147483647, %v1411_v46  ;;  %v1406_v16 = vadd.f32 %v4020_v14, %v1405_v54  ;;  %v1606_v59 = vsel %vm1530_vm5, %v4145_v8, 0.0  ;;  %vm1490_vm15 = vcmp.gt.f32.partialorder %v1458_v25, 0.5 }
 0x30e   : > { %1607 = vadd.xlane.f32.xlu1 %v1606_v59  ;;  %v2989_v0 = vpop.f32.mrf.mxu1  ;;  %v4150_v32 = vsel %vm1490_vm15, %v1396_v24, 0.0 }
 0x30f   : > { %v1460_v55 = vand.u32 2147483647, %v1406_v16  ;;  %v1421_v57 = vadd.f32 %v2989_v0, %v4020_v14  ;;  %v1603_v38 = vsel %vm1530_vm5, %v4150_v32, 0.0  ;;  %vm1493_vm0 = vcmp.gt.f32.partialorder %v1461_v13, 0.5 }
 0x310   : > { %1604 = vadd.xlane.f32.xlu0 %v1603_v38  ;;  %v1415_v19 = vpop.f32.mrf.mxu1  ;;  %v4155_v40 = vsel %vm1493_vm0, %v1411_v46, 0.0 }
 0x311   : > { %v1463_v27 = vand.u32 2147483647, %v1421_v57  ;;  %v1416_v53 = vadd.f32 %v4020_v14, %v1415_v19  ;;  %v1612_v11 = vsel %vm1530_vm5, %v4155_v40, 0.0  ;;  %vm1492_vm1 = vcmp.gt.f32.partialorder %v1460_v55, 0.5 }
 0x312   : > { %1613 = vadd.xlane.f32.xlu1 %v1612_v11  ;;  %v2992_v7 = vpop.f32.mrf.mxu1  ;;  %v4160_v47 = vsel %vm1492_vm1, %v1406_v16, 0.0 }
 0x313   : > { %v1462_v3 = vand.u32 2147483647, %v1416_v53  ;;  %v1431_v30 = vadd.f32 %v2992_v7, %v4020_v14  ;;  %v1609_v18 = vsel %vm1530_vm5, %v4160_v47, 0.0  ;;  %vm1495_vm2 = vcmp.gt.f32.partialorder %v1463_v27, 0.5 }
 0x314   : > { %1610 = vadd.xlane.f32.xlu0 %v1609_v18  ;;  %v1425_v56 = vpop.f32.mrf.mxu1  ;;  %v4165_v31 = vsel %vm1495_vm2, %v1421_v57, 0.0 }
 0x315   : > { %v1465_v34 = vand.u32 2147483647, %v1431_v30  ;;  %v1426_v45 = vadd.f32 %v4020_v14, %v1425_v56  ;;  %v1618_v37 = vsel %vm1530_vm5, %v4165_v31, 0.0  ;;  %vm1494_vm4 = vcmp.gt.f32.partialorder %v1462_v3, 0.5 }
 0x316   : > { %1619 = vadd.xlane.f32.xlu1 %v1618_v37  ;;  %v4170_v20 = vsel %vm1494_vm4, %v1416_v53, 0.0 }
 0x317   : > { %v1464_v43 = vand.u32 2147483647, %v1426_v45  ;;  %v1615_v4 = vsel %vm1530_vm5, %v4170_v20, 0.0  ;;  %vm1497_vm6 = vcmp.gt.f32.partialorder %v1465_v34, 0.5 }
 0x318   : > { %1616 = vadd.xlane.f32.xlu0 %v1615_v4  ;;  %v4174_v12 = vsel %vm1497_vm6, %v1431_v30, 0.0 }
 0x319   : > { %v1624_v33 = vsel %vm1530_vm5, %v4174_v12, 0.0  ;;  %vm1496_vm3 = vcmp.gt.f32.partialorder %v1464_v43, 0.5 }
 0x31a   : > { %1625 = vadd.xlane.f32.xlu1 %v1624_v33  ;;  %v4178_v14 = vsel %vm1496_vm3, %v1426_v45, 0.0 }
 0x31b   : > { %v1621_v15 = vsel %vm1530_vm5, %v4178_v14, 0.0 }
 0x31c   : > { %1622 = vadd.xlane.f32.xlu0 %v1621_v15 }
 0x367   : > { %v1536_v58 = vpop.xlane.xlu1 %1535 }
 0x368   : > { %v1629_v24 = vmul.f32 0.16666667, %v1536_v58 }
 0x369   : > { %v1533_v41 = vpop.xlane.xlu0 %1532 }
 0x36a   : > { %v4186_v42 = vsub.f32 %v4025_v60, %v1629_v24  ;;  %v1628_v25 = vmul.f32 0.16666667, %v1533_v41 }
 0x36b   : > { %v1542_v46 = vpop.xlane.xlu1 %1541 }
 0x36c   : > { %v4189_v48 = vsub.f32 %v4030_v62, %v1628_v25  ;;  %v1631_v54 = vmul.f32 0.16666667, %v1542_v46  ;;  %v1693_v13 = vmul.f32 %v4186_v42, %v4186_v42 }
 0x36d   : > { %v1539_v16 = vpop.xlane.xlu0 %1538 }
 0x36e   : > { %v4194_v59 = vsub.f32 %v4035_v6, %v1631_v54  ;;  %v1630_v0 = vmul.f32 0.16666667, %v1539_v16  ;;  %v1727_v55 = vsel %vm1530_vm5, %v1693_v13, 0.0  ;;  %v1692_v60 = vmul.f32 %v4189_v48, %v4189_v48 }
 0x36f   : > { %v1548_v57 = vpop.xlane.xlu1 %1547  ;;  %1728 = vadd.xlane.f32.xlu1 %v1727_v55 }
 0x370   : > { %v4200_v38 = vsub.f32 %v4040_v10, %v1630_v0  ;;  %v1633_v62 = vmul.f32 0.16666667, %v1548_v57  ;;  %v1724_v19 = vsel %vm1530_vm5, %v1692_v60, 0.0  ;;  %v1695_v27 = vmul.f32 %v4194_v59, %v4194_v59 }
 0x371   : > { %1725 = vadd.xlane.f32.xlu0 %v1724_v19  ;;  %v1545_v6 = vpop.xlane.xlu0 %1544 }
 0x372   : > { %v4206_v53 = vsub.f32 %v4045_v63, %v1633_v62  ;;  %v1632_v11 = vmul.f32 0.16666667, %v1545_v6  ;;  %v1733_v7 = vsel %vm1530_vm5, %v1695_v27, 0.0  ;;  %v1694_v3 = vmul.f32 %v4200_v38, %v4200_v38 }
 0x373   : > { %v1554_v30 = vpop.xlane.xlu1 %1553  ;;  %1734 = vadd.xlane.f32.xlu1 %v1733_v7 }
 0x374   : > { %v4212_v10 = vsub.f32 %v4050_v17, %v1632_v11  ;;  %v1635_v18 = vmul.f32 0.16666667, %v1554_v30  ;;  %v1730_v56 = vsel %vm1530_vm5, %v1694_v3, 0.0  ;;  %v1697_v34 = vmul.f32 %v4206_v53, %v4206_v53 }
 0x375   : > { %1731 = vadd.xlane.f32.xlu0 %v1730_v56  ;;  %v1551_v63 = vpop.xlane.xlu0 %1550 }
 0x376   : > { %v4218_v45 = vsub.f32 %v4055_v28, %v1635_v18  ;;  %v1634_v37 = vmul.f32 0.16666667, %v1551_v63  ;;  %v1739_v43 = vsel %vm1530_vm5, %v1697_v34, 0.0  ;;  %v1696_v4 = vmul.f32 %v4212_v10, %v4212_v10 }
 0x377   : > { %v1560_v33 = vpop.xlane.xlu1 %1559  ;;  %1740 = vadd.xlane.f32.xlu1 %v1739_v43 }
 0x378   : > { %v4224_v17 = vsub.f32 %v4060_v9, %v1634_v37  ;;  %v1637_v15 = vmul.f32 0.16666667, %v1560_v33  ;;  %v1736_v22 = vsel %vm1530_vm5, %v1696_v4, 0.0  ;;  %v1699_v58 = vmul.f32 %v4218_v45, %v4218_v45 }
 0x379   : > { %1737 = vadd.xlane.f32.xlu0 %v1736_v22  ;;  %v1557_v28 = vpop.xlane.xlu0 %1556 }
 0x37a   : > { %v4230_v24 = vsub.f32 %v4065_v29, %v1637_v15  ;;  %v1636_v41 = vmul.f32 0.16666667, %v1557_v28  ;;  %v1745_v25 = vsel %vm1530_vm5, %v1699_v58, 0.0  ;;  %v1698_v46 = vmul.f32 %v4224_v17, %v4224_v17 }
 0x37b   : > { %v1566_v54 = vpop.xlane.xlu1 %1565  ;;  %1746 = vadd.xlane.f32.xlu1 %v1745_v25 }
 0x37c   : > { %v4236_v9 = vsub.f32 %v4070_v1, %v1636_v41  ;;  %v1639_v13 = vmul.f32 0.16666667, %v1566_v54  ;;  %v1742_v16 = vsel %vm1530_vm5, %v1698_v46, 0.0  ;;  %v1701_v0 = vmul.f32 %v4230_v24, %v4230_v24 }
 0x37d   : > { %1743 = vadd.xlane.f32.xlu0 %v1742_v16  ;;  %v1563_v29 = vpop.xlane.xlu0 %1562 }
 0x37e   : > { %v4242_v55 = vsub.f32 %v4075_v61, %v1639_v13  ;;  %v1638_v60 = vmul.f32 0.16666667, %v1563_v29  ;;  %v1751_v57 = vsel %vm1530_vm5, %v1701_v0, 0.0  ;;  %v1700_v62 = vmul.f32 %v4236_v9, %v4236_v9 }
 0x37f   : > { %v1572_v19 = vpop.xlane.xlu1 %1571  ;;  %1752 = vadd.xlane.f32.xlu1 %v1751_v57 }
 0x380   : > { %v4248_v1 = vsub.f32 %v4080_v44, %v1638_v60  ;;  %v1641_v27 = vmul.f32 0.16666667, %v1572_v19  ;;  %v1748_v6 = vsel %vm1530_vm5, %v1700_v62, 0.0  ;;  %v1703_v11 = vmul.f32 %v4242_v55, %v4242_v55 }
 0x381   : > { %1749 = vadd.xlane.f32.xlu0 %v1748_v6  ;;  %v1569_v61 = vpop.xlane.xlu0 %1568 }
 0x382   : > { %v4254_v7 = vsub.f32 %v4085_v2, %v1641_v27  ;;  %v1640_v3 = vmul.f32 0.16666667, %v1569_v61  ;;  %v1757_v30 = vsel %vm1530_vm5, %v1703_v11, 0.0  ;;  %v1702_v18 = vmul.f32 %v4248_v1, %v4248_v1 }
 0x383   : > { %v1578_v56 = vpop.xlane.xlu1 %1577  ;;  %1758 = vadd.xlane.f32.xlu1 %v1757_v30 }
 0x384   : > { %v4260_v44 = vsub.f32 %v4090_v23, %v1640_v3  ;;  %v1643_v34 = vmul.f32 0.16666667, %v1578_v56  ;;  %v1754_v63 = vsel %vm1530_vm5, %v1702_v18, 0.0  ;;  %v1705_v37 = vmul.f32 %v4254_v7, %v4254_v7 }
 0x385   : > { %1755 = vadd.xlane.f32.xlu0 %v1754_v63  ;;  %v1575_v2 = vpop.xlane.xlu0 %1574 }
 0x386   : > { %v4266_v43 = vsub.f32 %v4095_v26, %v1643_v34  ;;  %v1642_v4 = vmul.f32 0.16666667, %v1575_v2  ;;  %v1763_v33 = vsel %vm1530_vm5, %v1705_v37, 0.0  ;;  %v1704_v15 = vmul.f32 %v4260_v44, %v4260_v44 }
 0x387   : > { %v1584_v22 = vpop.xlane.xlu1 %1583  ;;  %1764 = vadd.xlane.f32.xlu1 %v1763_v33 }
 0x388   : > { %v4272_v23 = vsub.f32 %v4100_v49, %v1642_v4  ;;  %v1645_v58 = vmul.f32 0.16666667, %v1584_v22  ;;  %v1760_v28 = vsel %vm1530_vm5, %v1704_v15, 0.0  ;;  %v1707_v41 = vmul.f32 %v4266_v43, %v4266_v43 }
 0x389   : > { %1761 = vadd.xlane.f32.xlu0 %v1760_v28  ;;  %v1581_v26 = vpop.xlane.xlu0 %1580 }
 0x38a   : > { %v4278_v25 = vsub.f32 %v4105_v35, %v1645_v58  ;;  %v1644_v46 = vmul.f32 0.16666667, %v1581_v26  ;;  %v1769_v54 = vsel %vm1530_vm5, %v1707_v41, 0.0  ;;  %v1706_v13 = vmul.f32 %v4272_v23, %v4272_v23 }
 0x38b   : > { %v1590_v16 = vpop.xlane.xlu1 %1589  ;;  %1770 = vadd.xlane.f32.xlu1 %v1769_v54 }
 0x38c   : > { %v4284_v49 = vsub.f32 %v4110_v5, %v1644_v46  ;;  %v1647_v0 = vmul.f32 0.16666667, %v1590_v16  ;;  %v1766_v29 = vsel %vm1530_vm5, %v1706_v13, 0.0  ;;  %v1709_v60 = vmul.f32 %v4278_v25, %v4278_v25 }
 0x38d   : > { %1767 = vadd.xlane.f32.xlu0 %v1766_v29  ;;  %v1587_v35 = vpop.xlane.xlu0 %1586 }
 0x38e   : > { %v4290_v57 = vsub.f32 %v4115_v52, %v1647_v0  ;;  %v1646_v62 = vmul.f32 0.16666667, %v1587_v35  ;;  %v1775_v19 = vsel %vm1530_vm5, %v1709_v60, 0.0  ;;  %v1708_v27 = vmul.f32 %v4284_v49, %v4284_v49 }
 0x38f   : > { %v1596_v6 = vpop.xlane.xlu1 %1595  ;;  %1776 = vadd.xlane.f32.xlu1 %v1775_v19 }
 0x390   : > { %v4296_v5 = vsub.f32 %v4120_v39, %v1646_v62  ;;  %v1649_v11 = vmul.f32 0.16666667, %v1596_v6  ;;  %v1772_v61 = vsel %vm1530_vm5, %v1708_v27, 0.0  ;;  %v1711_v3 = vmul.f32 %v4290_v57, %v4290_v57 }
 0x391   : > { %1773 = vadd.xlane.f32.xlu0 %v1772_v61  ;;  %v1593_v52 = vpop.xlane.xlu0 %1592 }
 0x392   : > { %v4302_v30 = vsub.f32 %v4125_v51, %v1649_v11  ;;  %v1648_v18 = vmul.f32 0.16666667, %v1593_v52  ;;  %v1781_v56 = vsel %vm1530_vm5, %v1711_v3, 0.0  ;;  %v1710_v34 = vmul.f32 %v4296_v5, %v4296_v5 }
 0x393   : > { %v1602_v63 = vpop.xlane.xlu1 %1601  ;;  %1782 = vadd.xlane.f32.xlu1 %v1781_v56 }
 0x394   : > { %v4308_v39 = vsub.f32 %v4130_v21, %v1648_v18  ;;  %v1651_v37 = vmul.f32 0.16666667, %v1602_v63  ;;  %v1778_v2 = vsel %vm1530_vm5, %v1710_v34, 0.0  ;;  %v1713_v4 = vmul.f32 %v4302_v30, %v4302_v30 }
 0x395   : > { %1779 = vadd.xlane.f32.xlu0 %v1778_v2  ;;  %v1599_v51 = vpop.xlane.xlu0 %1598 }
 0x396   : > { %v4314_v33 = vsub.f32 %v4135_v36, %v1651_v37  ;;  %v1650_v15 = vmul.f32 0.16666667, %v1599_v51  ;;  %v1787_v22 = vsel %vm1530_vm5, %v1713_v4, 0.0  ;;  %v1712_v58 = vmul.f32 %v4308_v39, %v4308_v39 }
 0x397   : > { %v1608_v28 = vpop.xlane.xlu1 %1607  ;;  %1788 = vadd.xlane.f32.xlu1 %v1787_v22 }
 0x398   : > { %v4320_v21 = vsub.f32 %v4140_v50, %v1650_v15  ;;  %v1653_v41 = vmul.f32 0.16666667, %v1608_v28  ;;  %v1784_v26 = vsel %vm1530_vm5, %v1712_v58, 0.0  ;;  %v1715_v46 = vmul.f32 %v4314_v33, %v4314_v33 }
 0x399   : > { %1785 = vadd.xlane.f32.xlu0 %v1784_v26  ;;  %v1605_v36 = vpop.xlane.xlu0 %1604 }
 0x39a   : > { %v4326_v54 = vsub.f32 %v4145_v8, %v1653_v41  ;;  %v1652_v13 = vmul.f32 0.16666667, %v1605_v36  ;;  %v1793_v16 = vsel %vm1530_vm5, %v1715_v46, 0.0  ;;  %v1714_v0 = vmul.f32 %v4320_v21, %v4320_v21 }
 0x39b   : > { %v1614_v29 = vpop.xlane.xlu1 %1613  ;;  %1794 = vadd.xlane.f32.xlu1 %v1793_v16 }
 0x39c   : > { %v4332_v50 = vsub.f32 %v4150_v32, %v1652_v13  ;;  %v1655_v60 = vmul.f32 0.16666667, %v1614_v29  ;;  %v1790_v35 = vsel %vm1530_vm5, %v1714_v0, 0.0  ;;  %v1717_v62 = vmul.f32 %v4326_v54, %v4326_v54 }
 0x39d   : > { %1791 = vadd.xlane.f32.xlu0 %v1790_v35  ;;  %v1611_v8 = vpop.xlane.xlu0 %1610 }
 0x39e   : > { %v4338_v19 = vsub.f32 %v4155_v40, %v1655_v60  ;;  %v1654_v27 = vmul.f32 0.16666667, %v1611_v8  ;;  %v1799_v6 = vsel %vm1530_vm5, %v1717_v62, 0.0  ;;  %v1716_v11 = vmul.f32 %v4332_v50, %v4332_v50 }
 0x39f   : > { %v1620_v61 = vpop.xlane.xlu1 %1619  ;;  %1800 = vadd.xlane.f32.xlu1 %v1799_v6 }
 0x3a0   : > { %v4344_v32 = vsub.f32 %v4160_v47, %v1654_v27  ;;  %v1657_v3 = vmul.f32 0.16666667, %v1620_v61  ;;  %v1796_v52 = vsel %vm1530_vm5, %v1716_v11, 0.0  ;;  %v1719_v18 = vmul.f32 %v4338_v19, %v4338_v19 }
 0x3a1   : > { %1797 = vadd.xlane.f32.xlu0 %v1796_v52  ;;  %v1617_v40 = vpop.xlane.xlu0 %1616 }
 0x3a2   : > { %v4350_v56 = vsub.f32 %v4165_v31, %v1657_v3  ;;  %v1656_v34 = vmul.f32 0.16666667, %v1617_v40  ;;  %v1805_v63 = vsel %vm1530_vm5, %v1719_v18, 0.0  ;;  %v1718_v37 = vmul.f32 %v4344_v32, %v4344_v32 }
 0x3a3   : > { %1806 = vadd.xlane.f32.xlu1 %v1805_v63  ;;  %v1626_v47 = vpop.xlane.xlu1 %1625 }
 0x3a4   : > { %v4356_v2 = vsub.f32 %v4170_v20, %v1656_v34  ;;  %v1659_v4 = vmul.f32 0.16666667, %v1626_v47  ;;  %v1802_v51 = vsel %vm1530_vm5, %v1718_v37, 0.0  ;;  %v1721_v15 = vmul.f32 %v4350_v56, %v4350_v56 }
 0x3a5   : > { %1803 = vadd.xlane.f32.xlu0 %v1802_v51  ;;  %v1623_v31 = vpop.xlane.xlu0 %1622 }
 0x3a6   : > { %v4362_v22 = vsub.f32 %v4174_v12, %v1659_v4  ;;  %v1658_v58 = vmul.f32 0.16666667, %v1623_v31  ;;  %v1811_v28 = vsel %vm1530_vm5, %v1721_v15, 0.0  ;;  %v1720_v41 = vmul.f32 %v4356_v2, %v4356_v2 }
 0x3a7   : > { %1812 = vadd.xlane.f32.xlu1 %v1811_v28 }
 0x3a8   : > { %v4368_v20 = vsub.f32 %v4178_v14, %v1658_v58  ;;  %v1808_v26 = vsel %vm1530_vm5, %v1720_v41, 0.0  ;;  %v1723_v46 = vmul.f32 %v4362_v22, %v4362_v22 }
 0x3a9   : > { %1809 = vadd.xlane.f32.xlu0 %v1808_v26 }
 0x3aa   : > { %v1817_v36 = vsel %vm1530_vm5, %v1723_v46, 0.0  ;;  %v1722_v12 = vmul.f32 %v4368_v20, %v4368_v20 }
 0x3ab   : > { %1818 = vadd.xlane.f32.xlu1 %v1817_v36 }
 0x3ac   : > { %v1814_v13 = vsel %vm1530_vm5, %v1722_v12, 0.0 }
 0x3ad   : > { %1815 = vadd.xlane.f32.xlu0 %v1814_v13 }
 0x3f8   : > { %v1729_v16 = vpop.xlane.xlu1 %1728 }
 0x3f9   : > { %v1821_v0 = vmul.f32 0.16666667, %v1729_v16 }
 0x3fa   : > { %v1726_v29 = vpop.xlane.xlu0 %1725 }
 0x3fb   : > { %v1853_v14 = vadd.f32 1e-05, %v1821_v0  ;;  %v1820_v60 = vmul.f32 0.16666667, %v1726_v29 }
 0x3fc   : > { %v1735_v35 = vpop.xlane.xlu1 %1734 }
 0x3fd   : > { %v1852_v62 = vadd.f32 1e-05, %v1820_v60  ;;  %v1823_v8 = vmul.f32 0.16666667, %v1735_v35  ;;  %3152 = vrsqrt.f32 %v1853_v14 }
 0x3fe   : > { %v1732_v27 = vpop.xlane.xlu0 %1731 }
 0x3ff   : > { %3154 = vrsqrt.f32 %v1852_v62  ;;  %v1855_v6 = vadd.f32 1e-05, %v1823_v8  ;;  %v1822_v11 = vmul.f32 0.16666667, %v1732_v27 }
 0x400   : > { %v1741_v61 = vpop.xlane.xlu1 %1740 }
 0x401   : > { %v1854_v3 = vadd.f32 1e-05, %v1822_v11  ;;  %v1825_v52 = vmul.f32 0.16666667, %v1741_v61  ;;  %3156 = vrsqrt.f32 %v1855_v6 }
 0x402   : > { %v1738_v18 = vpop.xlane.xlu0 %1737 }
 0x403   : > { %3158 = vrsqrt.f32 %v1854_v3  ;;  %v1857_v40 = vadd.f32 1e-05, %v1825_v52  ;;  %v1824_v34 = vmul.f32 0.16666667, %v1738_v18 }
 0x404   : > { %v1747_v63 = vpop.xlane.xlu1 %1746 }
 0x405   : > { %v1856_v37 = vadd.f32 1e-05, %v1824_v34  ;;  %v1827_v47 = vmul.f32 0.16666667, %v1747_v63  ;;  %3160 = vrsqrt.f32 %v1857_v40 }
 0x406   : > { %v1744_v4 = vpop.xlane.xlu0 %1743 }
 0x407   : > { %3162 = vrsqrt.f32 %v1856_v37  ;;  %v1859_v51 = vadd.f32 1e-05, %v1827_v47  ;;  %v1826_v15 = vmul.f32 0.16666667, %v1744_v4 }
 0x408   : > { %v1753_v31 = vpop.xlane.xlu1 %1752 }
 0x409   : > { %v1858_v58 = vadd.f32 1e-05, %v1826_v15  ;;  %v1829_v28 = vmul.f32 0.16666667, %v1753_v31  ;;  %3164 = vrsqrt.f32 %v1859_v51 }
 0x40a   : > { %v1750_v41 = vpop.xlane.xlu0 %1749  ;;  %v3153_v26 = vpop.eup %3152 }
 0x40b   : > { %3166 = vrsqrt.f32 %v1858_v58  ;;  %v1861_v46 = vadd.f32 1e-05, %v1829_v28  ;;  %v1828_v36 = vmul.f32 0.16666667, %v1750_v41  ;;  %v1917_v14 = vmul.f32 %v3153_v26, %v4186_v42 }
 0x40c   : > { %v3155_v12 = vpop.eup %3154  ;;  %v1759_v13 = vpop.xlane.xlu1 %1758 }
 0x40d   : > { %v1860_v16 = vadd.f32 1e-05, %v1828_v36  ;;  %v1831_v0 = vmul.f32 0.16666667, %v1759_v13  ;;  %v1916_v29 = vmul.f32 %v3155_v12, %v4189_v48  ;;  %3168 = vrsqrt.f32 %v1861_v46 }
 0x40e   : > { %v1756_v60 = vpop.xlane.xlu0 %1755  ;;  %v3157_v35 = vpop.eup %3156 }
 0x40f   : > { %3170 = vrsqrt.f32 %v1860_v16  ;;  %v1863_v62 = vadd.f32 1e-05, %v1831_v0  ;;  %v1830_v8 = vmul.f32 0.16666667, %v1756_v60  ;;  %2995 = vmatprep.mubr.msk.f32.mxu0 %vm1530_vm5, %v1916_v29  ;;  %v1919_v42 = vmul.f32 %v3157_v35, %v4194_v59 }
 0x410   : > { %v3159_v27 = vpop.eup %3158  ;;  %v1765_v6 = vpop.xlane.xlu1 %1764  ;;  %2996 = vmatmul.mubr.msk.f32.vlgmr.msra.gmra.mxu0 %vm1530_vm5, %v1917_v14 }
 0x411   : > { %v1862_v11 = vadd.f32 1e-05, %v1830_v8  ;;  %v1833_v61 = vmul.f32 0.16666667, %v1765_v6  ;;  %v1918_v3 = vmul.f32 %v3159_v27, %v4200_v38  ;;  %3172 = vrsqrt.f32 %v1863_v62 }
 0x412   : > { %v1762_v48 = vpop.xlane.xlu0 %1761  ;;  %v3161_v52 = vpop.eup %3160 }
 0x413   : > { %3174 = vrsqrt.f32 %v1862_v11  ;;  %v1865_v18 = vadd.f32 1e-05, %v1833_v61  ;;  %v1832_v40 = vmul.f32 0.16666667, %v1762_v48  ;;  %2998 = vmatprep.mubr.msk.f32.mxu0 %vm1530_vm5, %v1918_v3  ;;  %v1921_v51 = vmul.f32 %v3161_v52, %v4206_v53 }
 0x414   : > { %v3163_v34 = vpop.eup %3162  ;;  %v1771_v63 = vpop.xlane.xlu1 %1770  ;;  %2999 = vmatmul.mubr.msk.f32.gmra.mxu0 %vm1530_vm5, %v1919_v42 }
 0x415   : > { %v1864_v37 = vadd.f32 1e-05, %v1832_v40  ;;  %v1835_v47 = vmul.f32 0.16666667, %v1771_v63  ;;  %v1920_v4 = vmul.f32 %v3163_v34, %v4212_v10  ;;  %3176 = vrsqrt.f32 %v1865_v18 }
 0x416   : > { %v1768_v38 = vpop.xlane.xlu0 %1767  ;;  %v3165_v15 = vpop.eup %3164 }
 0x417   : > { %3178 = vrsqrt.f32 %v1864_v37  ;;  %v1867_v59 = vadd.f32 1e-05, %v1835_v47  ;;  %v1834_v31 = vmul.f32 0.16666667, %v1768_v38  ;;  %3001 = vmatprep.mubr.msk.f32.mxu0 %vm1530_vm5, %v1920_v4  ;;  %v1923_v36 = vmul.f32 %v3165_v15, %v4218_v45 }
 0x418   : > { %v3167_v58 = vpop.eup %3166  ;;  %v1777_v28 = vpop.xlane.xlu1 %1776  ;;  %3002 = vmatmul.mubr.msk.f32.gmra.mxu0 %vm1530_vm5, %v1921_v51 }
 0x419   : > { %v1866_v41 = vadd.f32 1e-05, %v1834_v31  ;;  %v1837_v26 = vmul.f32 0.16666667, %v1777_v28  ;;  %v1922_v46 = vmul.f32 %v3167_v58, %v4224_v17  ;;  %3180 = vrsqrt.f32 %v1867_v59 }
 0x41a   : > { %v1774_v10 = vpop.xlane.xlu0 %1773  ;;  %v3169_v12 = vpop.eup %3168 }
 0x41b   : > { %3182 = vrsqrt.f32 %v1866_v41  ;;  %v1869_v53 = vadd.f32 1e-05, %v1837_v26  ;;  %v1836_v13 = vmul.f32 0.16666667, %v1774_v10  ;;  %3004 = vmatprep.mubr.msk.f32.mxu0 %vm1530_vm5, %v1922_v46  ;;  %v1925_v35 = vmul.f32 %v3169_v12, %v4230_v24 }
 0x41c   : > { %v3171_v16 = vpop.eup %3170  ;;  %v1783_v0 = vpop.xlane.xlu1 %1782  ;;  %3005 = vmatmul.mubr.msk.f32.gmra.mxu0 %vm1530_vm5, %v1923_v36 }
 0x41d   : > { %v1868_v29 = vadd.f32 1e-05, %v1836_v13  ;;  %v1839_v14 = vmul.f32 0.16666667, %v1783_v0  ;;  %v1924_v60 = vmul.f32 %v3171_v16, %v4236_v9  ;;  %3184 = vrsqrt.f32 %v1869_v53 }
 0x41e   : > { %v1780_v17 = vpop.xlane.xlu0 %1779  ;;  %v3173_v62 = vpop.eup %3172 }
 0x41f   : > { %3186 = vrsqrt.f32 %v1868_v29  ;;  %v1871_v45 = vadd.f32 1e-05, %v1839_v14  ;;  %v1838_v8 = vmul.f32 0.16666667, %v1780_v17  ;;  %3007 = vmatprep.mubr.msk.f32.mxu0 %vm1530_vm5, %v1924_v60  ;;  %v1927_v48 = vmul.f32 %v3173_v62, %v4242_v55 }
 0x420   : > { %v3175_v27 = vpop.eup %3174  ;;  %v1789_v6 = vpop.xlane.xlu1 %1788  ;;  %3008 = vmatmul.mubr.msk.f32.gmra.mxu0 %vm1530_vm5, %v1925_v35 }
 0x421   : > { %v1870_v11 = vadd.f32 1e-05, %v1838_v8  ;;  %v1841_v61 = vmul.f32 0.16666667, %v1789_v6  ;;  %v1926_v3 = vmul.f32 %v3175_v27, %v4248_v1  ;;  %3188 = vrsqrt.f32 %v1871_v45 }
 0x422   : > { %v1786_v9 = vpop.xlane.xlu0 %1785  ;;  %v3177_v42 = vpop.eup %3176 }
 0x423   : > { %3190 = vrsqrt.f32 %v1870_v11  ;;  %v1873_v24 = vadd.f32 1e-05, %v1841_v61  ;;  %v1840_v52 = vmul.f32 0.16666667, %v1786_v9  ;;  %3010 = vmatprep.mubr.msk.f32.mxu0 %vm1530_vm5, %v1926_v3  ;;  %v1929_v47 = vmul.f32 %v3177_v42, %v4254_v7 }
 0x424   : > { %v3179_v18 = vpop.eup %3178  ;;  %v1795_v40 = vpop.xlane.xlu1 %1794  ;;  %3011 = vmatmul.mubr.msk.f32.gmra.mxu0 %vm1530_vm5, %v1927_v48 }
 0x425   : > { %v1872_v34 = vadd.f32 1e-05, %v1840_v52  ;;  %v1843_v63 = vmul.f32 0.16666667, %v1795_v40  ;;  %v1928_v37 = vmul.f32 %v3179_v18, %v4260_v44  ;;  %3192 = vrsqrt.f32 %v1873_v24 }
 0x426   : > { %v1792_v1 = vpop.xlane.xlu0 %1791  ;;  %v3181_v4 = vpop.eup %3180 }
 0x427   : > { %3194 = vrsqrt.f32 %v1872_v34  ;;  %v1875_v55 = vadd.f32 1e-05, %v1843_v63  ;;  %v1842_v38 = vmul.f32 0.16666667, %v1792_v1  ;;  %3013 = vmatprep.mubr.msk.f32.mxu0 %vm1530_vm5, %v1928_v37  ;;  %v1931_v28 = vmul.f32 %v3181_v4, %v4266_v43 }
 0x428   : > { %v3183_v51 = vpop.eup %3182  ;;  %v1801_v15 = vpop.xlane.xlu1 %1800  ;;  %3014 = vmatmul.mubr.msk.f32.gmra.mxu0 %vm1530_vm5, %v1929_v47 }
 0x429   : > { %v1874_v59 = vadd.f32 1e-05, %v1842_v38  ;;  %v1845_v31 = vmul.f32 0.16666667, %v1801_v15  ;;  %v1930_v58 = vmul.f32 %v3183_v51, %v4272_v23  ;;  %3196 = vrsqrt.f32 %v1875_v55 }
 0x42a   : > { %v1798_v44 = vpop.xlane.xlu0 %1797  ;;  %v3185_v41 = vpop.eup %3184 }
 0x42b   : > { %3198 = vrsqrt.f32 %v1874_v59  ;;  %v1877_v7 = vadd.f32 1e-05, %v1845_v31  ;;  %v1844_v26 = vmul.f32 0.16666667, %v1798_v44  ;;  %3016 = vmatprep.mubr.msk.f32.mxu0 %vm1530_vm5, %v1930_v58  ;;  %v1933_v13 = vmul.f32 %v3185_v41, %v4278_v25 }
 0x42c   : > { %v3187_v46 = vpop.eup %3186  ;;  %v1807_v10 = vpop.xlane.xlu1 %1806  ;;  %3017 = vmatmul.mubr.msk.f32.gmra.mxu0 %vm1530_vm5, %v1931_v28 }
 0x42d   : > { %v1876_v36 = vadd.f32 1e-05, %v1844_v26  ;;  %v1847_v12 = vmul.f32 0.16666667, %v1807_v10  ;;  %v1932_v53 = vmul.f32 %v3187_v46, %v4284_v49  ;;  %3200 = vrsqrt.f32 %v1877_v7 }
 0x42e   : > { %v1804_v23 = vpop.xlane.xlu0 %1803  ;;  %v3189_v16 = vpop.eup %3188 }
 0x42f   : > { %3202 = vrsqrt.f32 %v1876_v36  ;;  %v1879_v43 = vadd.f32 1e-05, %v1847_v12  ;;  %v1846_v0 = vmul.f32 0.16666667, %v1804_v23  ;;  %3019 = vmatprep.mubr.msk.f32.mxu0 %vm1530_vm5, %v1932_v53  ;;  %v1935_v62 = vmul.f32 %v3189_v16, %v4290_v57 }
 0x430   : > { %v3191_v29 = vpop.eup %3190  ;;  %v1813_v14 = vpop.xlane.xlu1 %1812  ;;  %3020 = vmatmul.mubr.msk.f32.gmra.mxu0 %vm1530_vm5, %v1933_v13 }
 0x431   : > { %v1878_v60 = vadd.f32 1e-05, %v1846_v0  ;;  %v1849_v17 = vmul.f32 0.16666667, %v1813_v14  ;;  %v1934_v35 = vmul.f32 %v3191_v29, %v4296_v5  ;;  %3204 = vrsqrt.f32 %v1879_v43 }
 0x432   : > { %v1810_v49 = vpop.xlane.xlu0 %1809  ;;  %v3193_v45 = vpop.eup %3192 }
 0x433   : > { %3206 = vrsqrt.f32 %v1878_v60  ;;  %v1881_v25 = vadd.f32 1e-05, %v1849_v17  ;;  %v1848_v8 = vmul.f32 0.16666667, %v1810_v49  ;;  %3022 = vmatprep.mubr.msk.f32.mxu0 %vm1530_vm5, %v1934_v35  ;;  %v1937_v9 = vmul.f32 %v3193_v45, %v4302_v30 }
 0x434   : > { %v3195_v27 = vpop.eup %3194  ;;  %v1819_v6 = vpop.xlane.xlu1 %1818  ;;  %3023 = vmatmul.mubr.msk.f32.gmra.mxu0 %vm1530_vm5, %v1935_v62 }
 0x435   : > { %v1880_v11 = vadd.f32 1e-05, %v1848_v8  ;;  %v1851_v61 = vmul.f32 0.16666667, %v1819_v6  ;;  %v1936_v3 = vmul.f32 %v3195_v27, %v4308_v39  ;;  %3208 = vrsqrt.f32 %v1881_v25 }
 0x436   : > { %v1816_v5 = vpop.xlane.xlu0 %1815  ;;  %v3197_v48 = vpop.eup %3196 }
 0x437   : > { %3210 = vrsqrt.f32 %v1880_v11  ;;  %v1883_v57 = vadd.f32 1e-05, %v1851_v61  ;;  %v1850_v42 = vmul.f32 0.16666667, %v1816_v5  ;;  %3025 = vmatprep.mubr.msk.f32.mxu0 %vm1530_vm5, %v1936_v3  ;;  %v1939_v40 = vmul.f32 %v3197_v48, %v4314_v33 }
 0x438   : > { %v3199_v24 = vpop.eup %3198  ;;  %3026 = vmatmul.mubr.msk.f32.gmra.mxu0 %vm1530_vm5, %v1937_v9 }
 0x439   : > { %v1882_v52 = vadd.f32 1e-05, %v1850_v42  ;;  %v1938_v18 = vmul.f32 %v3199_v24, %v4320_v21  ;;  %3212 = vrsqrt.f32 %v1883_v57 }
 0x43a   : > { %v3201_v39 = vpop.eup %3200 }
 0x43b   : > { %3214 = vrsqrt.f32 %v1882_v52  ;;  %3028 = vmatprep.mubr.msk.f32.mxu0 %vm1530_vm5, %v1938_v18  ;;  %v1941_v63 = vmul.f32 %v3201_v39, %v4326_v54 }
 0x43c   : > { %v3203_v30 = vpop.eup %3202  ;;  %3029 = vmatmul.mubr.msk.f32.gmra.mxu0 %vm1530_vm5, %v1939_v40 }
 0x43d   : > { %v1940_v34 = vmul.f32 %v3203_v30, %v4332_v50 }
 0x43e   : > { %v3205_v37 = vpop.eup %3204 }
 0x43f   : > { %3031 = vmatprep.mubr.msk.f32.mxu0 %vm1530_vm5, %v1940_v34  ;;  %v1943_v33 = vmul.f32 %v3205_v37, %v4338_v19 }
 0x440   : > { %v3207_v1 = vpop.eup %3206  ;;  %3032 = vmatmul.mubr.msk.f32.gmra.mxu0 %vm1530_vm5, %v1941_v63 }
 0x441   : > { %v1942_v21 = vmul.f32 %v3207_v1, %v4344_v32 }
 0x442   : > { %v3209_v47 = vpop.eup %3208 }
 0x443   : > { %3034 = vmatprep.mubr.msk.f32.mxu0 %vm1530_vm5, %v1942_v21  ;;  %v1945_v54 = vmul.f32 %v3209_v47, %v4350_v56 }
 0x444   : > { %v3211_v4 = vpop.eup %3210  ;;  %3035 = vmatmul.mubr.msk.f32.gmra.mxu0 %vm1530_vm5, %v1943_v33 }
 0x445   : > { %v1944_v50 = vmul.f32 %v3211_v4, %v4356_v2  ;;  %v4444_v2 = vld [vmem:[%s4826_s4 + $0x2] ss:$0 sm:$0xff] }
 0x446   : > { %v3213_v55 = vpop.eup %3212 }
 0x447   : > { %3037 = vmatprep.mubr.msk.f32.mxu0 %vm1530_vm5, %v1944_v50  ;;  %v1947_v19 = vmul.f32 %v3213_v55, %v4362_v22 }
 0x448   : > { %v3215_v38 = vpop.eup %3214  ;;  %3038 = vmatmul.mubr.msk.f32.gmra.mxu0 %vm1530_vm5, %v1945_v54 }
 0x449   : > { %v1946_v32 = vmul.f32 %v3215_v38, %v4368_v20 }
 0x44b   : > { %3040 = vmatprep.mubr.msk.f32.mxu0 %vm1530_vm5, %v1946_v32 }
 0x44c   : > { %3041 = vmatmul.mubr.msk.f32.gmra.mxu0 %vm1530_vm5, %v1947_v19 }
 0x4d0   : > { %v2997_v56 = vpop.f32.mrf.mxu0 }
 0x4d1   : > { %v4447_v51 = vadd.f32 %v2997_v56, %v4444_v2 }
 0x4d2   : > { %v2119_v15 = vpop.f32.mrf.mxu0 }
 0x4d3   : > { %v4450_v59 = vadd.f32 %v4444_v2, %v2119_v15  ;;  %2280 = vmax.xlane.f32.xlu1 %v4447_v51 }
 0x4d4   : > { %v3000_v22 = vpop.f32.mrf.mxu0 }
 0x4d5   : > { %v4454_v20 = vadd.f32 %v3000_v22, %v4444_v2  ;;  %2278 = vmax.xlane.f32.xlu0 %v4450_v59 }
 0x4d6   : > { %v2129_v31 = vpop.f32.mrf.mxu0 }
 0x4d7   : > { %v4458_v58 = vadd.f32 %v4444_v2, %v2129_v31  ;;  %2284 = vmax.xlane.f32.xlu1 %v4454_v20 }
 0x4d8   : > { %v3003_v44 = vpop.f32.mrf.mxu0 }
 0x4d9   : > { %v4462_v28 = vadd.f32 %v3003_v44, %v4444_v2  ;;  %2282 = vmax.xlane.f32.xlu0 %v4458_v58 }
 0x4da   : > { %v2139_v41 = vpop.f32.mrf.mxu0 }
 0x4db   : > { %v4466_v7 = vadd.f32 %v4444_v2, %v2139_v41  ;;  %2288 = vmax.xlane.f32.xlu1 %v4462_v28 }
 0x4dc   : > { %v3006_v26 = vpop.f32.mrf.mxu0 }
 0x4dd   : > { %v4470_v46 = vadd.f32 %v3006_v26, %v4444_v2  ;;  %2286 = vmax.xlane.f32.xlu0 %v4466_v7 }
 0x4de   : > { %v2149_v10 = vpop.f32.mrf.mxu0 }
 0x4df   : > { %v4474_v36 = vadd.f32 %v4444_v2, %v2149_v10  ;;  %2292 = vmax.xlane.f32.xlu1 %v4470_v46 }
 0x4e0   : > { %v3009_v12 = vpop.f32.mrf.mxu0 }
 0x4e1   : > { %v4478_v53 = vadd.f32 %v3009_v12, %v4444_v2  ;;  %2290 = vmax.xlane.f32.xlu0 %v4474_v36 }
 0x4e2   : > { %v2159_v23 = vpop.f32.mrf.mxu0 }
 0x4e3   : > { %v4482_v13 = vadd.f32 %v4444_v2, %v2159_v23  ;;  %2296 = vmax.xlane.f32.xlu1 %v4478_v53 }
 0x4e4   : > { %v3012_v16 = vpop.f32.mrf.mxu0 }
 0x4e5   : > { %v4486_v43 = vadd.f32 %v3012_v16, %v4444_v2  ;;  %2294 = vmax.xlane.f32.xlu0 %v4482_v13 }
 0x4e6   : > { %v2169_v0 = vpop.f32.mrf.mxu0 }
 0x4e7   : > { %v4490_v29 = vadd.f32 %v4444_v2, %v2169_v0  ;;  %2300 = vmax.xlane.f32.xlu1 %v4486_v43 }
 0x4e8   : > { %v3015_v14 = vpop.f32.mrf.mxu0 }
 0x4e9   : > { %v4494_v60 = vadd.f32 %v3015_v14, %v4444_v2  ;;  %2298 = vmax.xlane.f32.xlu0 %v4490_v29 }
 0x4ea   : > { %v2179_v17 = vpop.f32.mrf.mxu0 }
 0x4eb   : > { %v4498_v35 = vadd.f32 %v4444_v2, %v2179_v17  ;;  %2304 = vmax.xlane.f32.xlu1 %v4494_v60 }
 0x4ec   : > { %v3018_v49 = vpop.f32.mrf.mxu0 }
 0x4ed   : > { %v4502_v62 = vadd.f32 %v3018_v49, %v4444_v2  ;;  %2302 = vmax.xlane.f32.xlu0 %v4498_v35 }
 0x4ee   : > { %v2189_v45 = vpop.f32.mrf.mxu0 }
 0x4ef   : > { %v4506_v25 = vadd.f32 %v4444_v2, %v2189_v45  ;;  %2308 = vmax.xlane.f32.xlu1 %v4502_v62 }
 0x4f0   : > { %v3021_v8 = vpop.f32.mrf.mxu0 }
 0x4f1   : > { %v4510_v27 = vadd.f32 %v3021_v8, %v4444_v2  ;;  %2306 = vmax.xlane.f32.xlu0 %v4506_v25 }
 0x4f2   : > { %v2199_v6 = vpop.f32.mrf.mxu0 }
 0x4f3   : > { %v4514_v11 = vadd.f32 %v4444_v2, %v2199_v6  ;;  %2312 = vmax.xlane.f32.xlu1 %v4510_v27 }
 0x4f4   : > { %v3024_v61 = vpop.f32.mrf.mxu0 }
 0x4f5   : > { %v4518_v3 = vadd.f32 %v3024_v61, %v4444_v2  ;;  %2310 = vmax.xlane.f32.xlu0 %v4514_v11 }
 0x4f6   : > { %v2209_v5 = vpop.f32.mrf.mxu0 }
 0x4f7   : > { %v4522_v9 = vadd.f32 %v4444_v2, %v2209_v5  ;;  %2316 = vmax.xlane.f32.xlu1 %v4518_v3 }
 0x4f8   : > { %v3027_v48 = vpop.f32.mrf.mxu0 }
 0x4f9   : > { %v4526_v57 = vadd.f32 %v3027_v48, %v4444_v2  ;;  %2314 = vmax.xlane.f32.xlu0 %v4522_v9 }
 0x4fa   : > { %v2219_v42 = vpop.f32.mrf.mxu0 }
 0x4fb   : > { %v4530_v24 = vadd.f32 %v4444_v2, %v2219_v42  ;;  %2320 = vmax.xlane.f32.xlu1 %v4526_v57 }
 0x4fc   : > { %v3030_v52 = vpop.f32.mrf.mxu0 }
 0x4fd   : > { %v4534_v18 = vadd.f32 %v3030_v52, %v4444_v2  ;;  %2318 = vmax.xlane.f32.xlu0 %v4530_v24 }
 0x4fe   : > { %v2229_v40 = vpop.f32.mrf.mxu0 }
 0x4ff   : > { %v4538_v39 = vadd.f32 %v4444_v2, %v2229_v40  ;;  %2324 = vmax.xlane.f32.xlu1 %v4534_v18 }
 0x500   : > { %v3033_v30 = vpop.f32.mrf.mxu0 }
 0x501   : > { %v4542_v34 = vadd.f32 %v3033_v30, %v4444_v2  ;;  %2322 = vmax.xlane.f32.xlu0 %v4538_v39 }
 0x502   : > { %v2239_v63 = vpop.f32.mrf.mxu0 }
 0x503   : > { %v4546_v37 = vadd.f32 %v4444_v2, %v2239_v63  ;;  %2328 = vmax.xlane.f32.xlu1 %v4542_v34 }
 0x504   : > { %v3036_v1 = vpop.f32.mrf.mxu0 }
 0x505   : > { %v4550_v21 = vadd.f32 %v3036_v1, %v4444_v2  ;;  %2326 = vmax.xlane.f32.xlu0 %v4546_v37 }
 0x506   : > { %v2249_v33 = vpop.f32.mrf.mxu0 }
 0x507   : > { %v4554_v47 = vadd.f32 %v4444_v2, %v2249_v33  ;;  %2332 = vmax.xlane.f32.xlu1 %v4550_v21 }
 0x508   : > { %v3039_v4 = vpop.f32.mrf.mxu0 }
 0x509   : > { %v4558_v50 = vadd.f32 %v3039_v4, %v4444_v2  ;;  %2330 = vmax.xlane.f32.xlu0 %v4554_v47 }
 0x50a   : > { %v2259_v54 = vpop.f32.mrf.mxu0 }
 0x50b   : > { %v4562_v55 = vadd.f32 %v4444_v2, %v2259_v54  ;;  %2336 = vmax.xlane.f32.xlu1 %v4558_v50 }
 0x50c   : > { %v3042_v38 = vpop.f32.mrf.mxu0 }
 0x50d   : > { %v4566_v32 = vadd.f32 %v3042_v38, %v4444_v2  ;;  %2334 = vmax.xlane.f32.xlu0 %v4562_v55 }
 0x50e   : > { %v2269_v19 = vpop.f32.mrf.mxu0 }
 0x50f   : > { %v4570_v56 = vadd.f32 %v4444_v2, %v2269_v19  ;;  %2340 = vmax.xlane.f32.xlu1 %v4566_v32 }
 0x511   : > { %2338 = vmax.xlane.f32.xlu0 %v4570_v56 }
 0x55c   : > { %v2281_v15 = vpop.xlane.xlu1 %2280 }
 0x55d   : > { %v2343_v22 = vsub.f32 %v4447_v51, %v2281_v15 }
 0x55e   : > { %v2279_v31 = vpop.xlane.xlu0 %2278 }
 0x55f   : > { %v2376_v44 = vmul.f32 1.442695, %v2343_v22  ;;  %v2342_v41 = vsub.f32 %v4450_v59, %v2279_v31 }
 0x560   : > { %v2285_v26 = vpop.xlane.xlu1 %2284 }
 0x561   : > { %3216 = vpow2.f32 %v2376_v44  ;;  %v2374_v10 = vmul.f32 1.442695, %v2342_v41  ;;  %v2345_v12 = vsub.f32 %v4454_v20, %v2285_v26 }
 0x562   : > { %v2283_v23 = vpop.xlane.xlu0 %2282 }
 0x563   : > { %3218 = vpow2.f32 %v2374_v10  ;;  %v2380_v2 = vmul.f32 1.442695, %v2345_v12  ;;  %v2344_v16 = vsub.f32 %v4458_v58, %v2283_v23 }
 0x564   : > { %v2289_v0 = vpop.xlane.xlu1 %2288 }
 0x565   : > { %3220 = vpow2.f32 %v2380_v2  ;;  %v2378_v14 = vmul.f32 1.442695, %v2344_v16  ;;  %v2347_v17 = vsub.f32 %v4462_v28, %v2289_v0 }
 0x566   : > { %v2287_v51 = vpop.xlane.xlu0 %2286 }
 0x567   : > { %3222 = vpow2.f32 %v2378_v14  ;;  %v2384_v49 = vmul.f32 1.442695, %v2347_v17  ;;  %v2346_v59 = vsub.f32 %v4466_v7, %v2287_v51 }
 0x568   : > { %v2293_v45 = vpop.xlane.xlu1 %2292 }
 0x569   : > { %3224 = vpow2.f32 %v2384_v49  ;;  %v2382_v8 = vmul.f32 1.442695, %v2346_v59  ;;  %v2349_v20 = vsub.f32 %v4470_v46, %v2293_v45 }
 0x56a   : > { %v2291_v6 = vpop.xlane.xlu0 %2290 }
 0x56b   : > { %3226 = vpow2.f32 %v2382_v8  ;;  %v2388_v61 = vmul.f32 1.442695, %v2349_v20  ;;  %v2348_v58 = vsub.f32 %v4474_v36, %v2291_v6 }
 0x56c   : > { %v2297_v5 = vpop.xlane.xlu1 %2296 }
 0x56d   : > { %3228 = vpow2.f32 %v2388_v61  ;;  %v2386_v48 = vmul.f32 1.442695, %v2348_v58  ;;  %v2351_v28 = vsub.f32 %v4478_v53, %v2297_v5 }
 0x56e   : > { %v4583_v42 = vpop.eup %3216  ;;  %v2295_v52 = vpop.xlane.xlu0 %2294 }
 0x56f   : > { %3230 = vpow2.f32 %v2386_v48  ;;  %v2392_v7 = vmul.f32 1.442695, %v2351_v28  ;;  %v2350_v40 = vsub.f32 %v4482_v13, %v2295_v52  ;;  %2440 = vadd.xlane.f32.xlu1 %v4583_v42 }
 0x570   : > { %v4587_v46 = vpop.eup %3218  ;;  %v2301_v30 = vpop.xlane.xlu1 %2300 }
 0x571   : > { %3232 = vpow2.f32 %v2392_v7  ;;  %v2390_v63 = vmul.f32 1.442695, %v2350_v40  ;;  %v2353_v36 = vsub.f32 %v4486_v43, %v2301_v30  ;;  %2438 = vadd.xlane.f32.xlu0 %v4587_v46 }
 0x572   : > { %v4591_v1 = vpop.eup %3220  ;;  %v2299_v53 = vpop.xlane.xlu0 %2298 }
 0x573   : > { %3234 = vpow2.f32 %v2390_v63  ;;  %v2396_v33 = vmul.f32 1.442695, %v2353_v36  ;;  %v2352_v4 = vsub.f32 %v4490_v29, %v2299_v53  ;;  %2444 = vadd.xlane.f32.xlu1 %v4591_v1 }
 0x574   : > { %v4595_v13 = vpop.eup %3222  ;;  %v2305_v54 = vpop.xlane.xlu1 %2304 }
 0x575   : > { %3236 = vpow2.f32 %v2396_v33  ;;  %v2394_v38 = vmul.f32 1.442695, %v2352_v4  ;;  %v2355_v19 = vsub.f32 %v4494_v60, %v2305_v54  ;;  %2442 = vadd.xlane.f32.xlu0 %v4595_v13 }
 0x576   : > { %v4599_v43 = vpop.eup %3224  ;;  %v2303_v15 = vpop.xlane.xlu0 %2302 }
 0x577   : > { %3238 = vpow2.f32 %v2394_v38  ;;  %v2400_v22 = vmul.f32 1.442695, %v2355_v19  ;;  %v2354_v31 = vsub.f32 %v4498_v35, %v2303_v15  ;;  %2448 = vadd.xlane.f32.xlu1 %v4599_v43 }
 0x578   : > { %v4603_v29 = vpop.eup %3226  ;;  %v2309_v44 = vpop.xlane.xlu1 %2308 }
 0x579   : > { %3240 = vpow2.f32 %v2400_v22  ;;  %v2398_v41 = vmul.f32 1.442695, %v2354_v31  ;;  %v2357_v26 = vsub.f32 %v4502_v62, %v2309_v44  ;;  %2446 = vadd.xlane.f32.xlu0 %v4603_v29 }
 0x57a   : > { %v4607_v60 = vpop.eup %3228  ;;  %v2307_v10 = vpop.xlane.xlu0 %2306 }
 0x57b   : > { %3242 = vpow2.f32 %v2398_v41  ;;  %v2404_v12 = vmul.f32 1.442695, %v2357_v26  ;;  %v2356_v23 = vsub.f32 %v4506_v25, %v2307_v10  ;;  %2452 = vadd.xlane.f32.xlu1 %v4607_v60 }
 0x57c   : > { %v4611_v35 = vpop.eup %3230  ;;  %v2313_v2 = vpop.xlane.xlu1 %2312 }
 0x57d   : > { %3244 = vpow2.f32 %v2404_v12  ;;  %v2402_v16 = vmul.f32 1.442695, %v2356_v23  ;;  %v2359_v0 = vsub.f32 %v4510_v27, %v2313_v2  ;;  %2450 = vadd.xlane.f32.xlu0 %v4611_v35 }
 0x57e   : > { %v4615_v62 = vpop.eup %3232  ;;  %v2311_v14 = vpop.xlane.xlu0 %2310 }
 0x57f   : > { %3246 = vpow2.f32 %v2402_v16  ;;  %v2408_v17 = vmul.f32 1.442695, %v2359_v0  ;;  %v2358_v51 = vsub.f32 %v4514_v11, %v2311_v14  ;;  %2456 = vadd.xlane.f32.xlu1 %v4615_v62 }
 0x580   : > { %v4619_v25 = vpop.eup %3234  ;;  %v2317_v49 = vpop.xlane.xlu1 %2316 }
 0x581   : > { %3248 = vpow2.f32 %v2408_v17  ;;  %v2406_v59 = vmul.f32 1.442695, %v2358_v51  ;;  %v2361_v45 = vsub.f32 %v4518_v3, %v2317_v49  ;;  %2454 = vadd.xlane.f32.xlu0 %v4619_v25 }
 0x582   : > { %v4623_v27 = vpop.eup %3236  ;;  %v2315_v8 = vpop.xlane.xlu0 %2314 }
 0x583   : > { %3250 = vpow2.f32 %v2406_v59  ;;  %v2412_v20 = vmul.f32 1.442695, %v2361_v45  ;;  %v2360_v6 = vsub.f32 %v4522_v9, %v2315_v8  ;;  %2460 = vadd.xlane.f32.xlu1 %v4623_v27 }
 0x584   : > { %v4627_v11 = vpop.eup %3238  ;;  %v2321_v61 = vpop.xlane.xlu1 %2320 }
 0x585   : > { %3252 = vpow2.f32 %v2412_v20  ;;  %v2410_v58 = vmul.f32 1.442695, %v2360_v6  ;;  %v2363_v5 = vsub.f32 %v4526_v57, %v2321_v61  ;;  %2458 = vadd.xlane.f32.xlu0 %v4627_v11 }
 0x586   : > { %v4631_v3 = vpop.eup %3240  ;;  %v2319_v48 = vpop.xlane.xlu0 %2318 }
 0x587   : > { %3254 = vpow2.f32 %v2410_v58  ;;  %v2416_v28 = vmul.f32 1.442695, %v2363_v5  ;;  %v2362_v52 = vsub.f32 %v4530_v24, %v2319_v48  ;;  %2464 = vadd.xlane.f32.xlu1 %v4631_v3 }
 0x588   : > { %v4635_v9 = vpop.eup %3242  ;;  %v2325_v7 = vpop.xlane.xlu1 %2324 }
 0x589   : > { %3256 = vpow2.f32 %v2416_v28  ;;  %v2414_v40 = vmul.f32 1.442695, %v2362_v52  ;;  %v2365_v30 = vsub.f32 %v4534_v18, %v2325_v7  ;;  %2462 = vadd.xlane.f32.xlu0 %v4635_v9 }
 0x58a   : > { %v4639_v57 = vpop.eup %3244  ;;  %v2323_v63 = vpop.xlane.xlu0 %2322 }
 0x58b   : > { %3258 = vpow2.f32 %v2414_v40  ;;  %v2420_v36 = vmul.f32 1.442695, %v2365_v30  ;;  %v2364_v53 = vsub.f32 %v4538_v39, %v2323_v63  ;;  %2468 = vadd.xlane.f32.xlu1 %v4639_v57 }
 0x58c   : > { %v4643_v24 = vpop.eup %3246  ;;  %v2329_v33 = vpop.xlane.xlu1 %2328 }
 0x58d   : > { %3260 = vpow2.f32 %v2420_v36  ;;  %v2418_v4 = vmul.f32 1.442695, %v2364_v53  ;;  %v2367_v54 = vsub.f32 %v4542_v34, %v2329_v33  ;;  %2466 = vadd.xlane.f32.xlu0 %v4643_v24 }
 0x58e   : > { %v4647_v18 = vpop.eup %3248  ;;  %v2327_v38 = vpop.xlane.xlu0 %2326 }
 0x58f   : > { %3262 = vpow2.f32 %v2418_v4  ;;  %v2424_v19 = vmul.f32 1.442695, %v2367_v54  ;;  %v2366_v15 = vsub.f32 %v4546_v37, %v2327_v38  ;;  %2472 = vadd.xlane.f32.xlu1 %v4647_v18 }
 0x590   : > { %v4651_v39 = vpop.eup %3250  ;;  %v2333_v22 = vpop.xlane.xlu1 %2332 }
 0x591   : > { %3264 = vpow2.f32 %v2424_v19  ;;  %v2422_v31 = vmul.f32 1.442695, %v2366_v15  ;;  %v2369_v44 = vsub.f32 %v4550_v21, %v2333_v22  ;;  %2470 = vadd.xlane.f32.xlu0 %v4651_v39 }
 0x592   : > { %v4655_v34 = vpop.eup %3252  ;;  %v2331_v41 = vpop.xlane.xlu0 %2330 }
 0x593   : > { %3266 = vpow2.f32 %v2422_v31  ;;  %v2428_v26 = vmul.f32 1.442695, %v2369_v44  ;;  %v2368_v10 = vsub.f32 %v4554_v47, %v2331_v41  ;;  %2476 = vadd.xlane.f32.xlu1 %v4655_v34 }
 0x594   : > { %v4659_v37 = vpop.eup %3254  ;;  %v2337_v12 = vpop.xlane.xlu1 %2336 }
 0x595   : > { %3268 = vpow2.f32 %v2428_v26  ;;  %v2426_v23 = vmul.f32 1.442695, %v2368_v10  ;;  %v2371_v2 = vsub.f32 %v4558_v50, %v2337_v12  ;;  %2474 = vadd.xlane.f32.xlu0 %v4659_v37 }
 0x596   : > { %v4663_v21 = vpop.eup %3256  ;;  %v2335_v16 = vpop.xlane.xlu0 %2334 }
 0x597   : > { %3270 = vpow2.f32 %v2426_v23  ;;  %v2432_v0 = vmul.f32 1.442695, %v2371_v2  ;;  %v2370_v14 = vsub.f32 %v4562_v55, %v2335_v16  ;;  %2480 = vadd.xlane.f32.xlu1 %v4663_v21 }
 0x598   : > { %v4667_v47 = vpop.eup %3258  ;;  %v2341_v17 = vpop.xlane.xlu1 %2340 }
 0x599   : > { %3272 = vpow2.f32 %v2432_v0  ;;  %v2430_v51 = vmul.f32 1.442695, %v2370_v14  ;;  %v2373_v49 = vsub.f32 %v4566_v32, %v2341_v17  ;;  %2478 = vadd.xlane.f32.xlu0 %v4667_v47 }
 0x59a   : > { %v4671_v50 = vpop.eup %3260  ;;  %v2339_v59 = vpop.xlane.xlu0 %2338 }
 0x59b   : > { %3274 = vpow2.f32 %v2430_v51  ;;  %v2436_v45 = vmul.f32 1.442695, %v2373_v49  ;;  %v2372_v8 = vsub.f32 %v4570_v56, %v2339_v59  ;;  %2484 = vadd.xlane.f32.xlu1 %v4671_v50 }
 0x59c   : > { %v4675_v55 = vpop.eup %3262 }
 0x59d   : > { %3276 = vpow2.f32 %v2436_v45  ;;  %v2434_v20 = vmul.f32 1.442695, %v2372_v8  ;;  %2482 = vadd.xlane.f32.xlu0 %v4675_v55 }
 0x59e   : > { %v4678_v6 = vpop.eup %3264 }
 0x59f   : > { %3278 = vpow2.f32 %v2434_v20  ;;  %2488 = vadd.xlane.f32.xlu1 %v4678_v6 }
 0x5a0   : > { %v4681_v32 = vpop.eup %3266 }
 0x5a1   : > { %2486 = vadd.xlane.f32.xlu0 %v4681_v32 }
 0x5a2   : > { %v4684_v61 = vpop.eup %3268 }
 0x5a3   : > { %2492 = vadd.xlane.f32.xlu1 %v4684_v61 }
 0x5a4   : > { %v4687_v56 = vpop.eup %3270 }
 0x5a5   : > { %2490 = vadd.xlane.f32.xlu0 %v4687_v56 }
 0x5a6   : > { %v4690_v58 = vpop.eup %3272 }
 0x5a7   : > { %2496 = vadd.xlane.f32.xlu1 %v4690_v58 }
 0x5a8   : > { %v4693_v5 = vpop.eup %3274 }
 0x5a9   : > { %2494 = vadd.xlane.f32.xlu0 %v4693_v5 }
 0x5aa   : > { %v4696_v48 = vpop.eup %3276 }
 0x5ab   : > { %2500 = vadd.xlane.f32.xlu1 %v4696_v48 }
 0x5ac   : > { %v4699_v28 = vpop.eup %3278 }
 0x5ad   : > { %2498 = vadd.xlane.f32.xlu0 %v4699_v28 }
 0x5f8   : > { %v2441_v52 = vpop.xlane.xlu1 %2440 }
 0x5f9   : > { %3280 = vrcp.f32 %v2441_v52 }
 0x5fa   : > { %v2439_v7 = vpop.xlane.xlu0 %2438 }
 0x5fb   : > { %3282 = vrcp.f32 %v2439_v7 }
 0x5fc   : > { %v2445_v40 = vpop.xlane.xlu1 %2444 }
 0x5fd   : > { %3284 = vrcp.f32 %v2445_v40 }
 0x5fe   : > { %v2443_v30 = vpop.xlane.xlu0 %2442 }
 0x5ff   : > { %3286 = vrcp.f32 %v2443_v30 }
 0x600   : > { %v2449_v63 = vpop.xlane.xlu1 %2448 }
 0x601   : > { %3288 = vrcp.f32 %v2449_v63 }
 0x602   : > { %v2447_v36 = vpop.xlane.xlu0 %2446 }
 0x603   : > { %3290 = vrcp.f32 %v2447_v36 }
 0x604   : > { %v2453_v53 = vpop.xlane.xlu1 %2452 }
 0x605   : > { %3292 = vrcp.f32 %v2453_v53 }
 0x606   : > { %v3281_v33 = vpop.eup %3280  ;;  %v2451_v4 = vpop.xlane.xlu0 %2450 }
 0x607   : > { %v2535_v54 = vmul.f32 %v3281_v33, %v4583_v42  ;;  %3294 = vrcp.f32 %v2451_v4 }
 0x608   : > { %v3283_v38 = vpop.eup %3282  ;;  %v2457_v19 = vpop.xlane.xlu1 %2456 }
 0x609   : > { %2567 = vst [vmem:[%s4706_s12 + $0x8] sm:$0xff] %v2535_v54  ;;  %v2534_v15 = vmul.f32 %v3283_v38, %v4587_v46  ;;  %3296 = vrcp.f32 %v2457_v19 }
 0x60a   : > { %v3285_v22 = vpop.eup %3284  ;;  %v2455_v31 = vpop.xlane.xlu0 %2454 }
 0x60b   : > { %2566 = vst [vmem:[%s4706_s12] sm:$0xff] %v2534_v15  ;;  %v2537_v44 = vmul.f32 %v3285_v22, %v4591_v1  ;;  %3298 = vrcp.f32 %v2455_v31 }
 0x60c   : > { %v3287_v42 = vpop.eup %3286  ;;  %v2461_v41 = vpop.xlane.xlu1 %2460 }
 0x60d   : > { %2569 = vst [vmem:[%s4706_s12 + $0x18] sm:$0xff] %v2537_v44  ;;  %v2536_v26 = vmul.f32 %v3287_v42, %v4595_v13  ;;  %3300 = vrcp.f32 %v2461_v41 }
 0x60e   : > { %v3289_v10 = vpop.eup %3288  ;;  %v2459_v12 = vpop.xlane.xlu0 %2458 }
 0x60f   : > { %2568 = vst [vmem:[%s4706_s12 + $0x10] sm:$0xff] %v2536_v26  ;;  %v2539_v46 = vmul.f32 %v3289_v10, %v4599_v43  ;;  %3302 = vrcp.f32 %v2459_v12 }
 0x610   : > { %v3291_v23 = vpop.eup %3290  ;;  %v2465_v2 = vpop.xlane.xlu1 %2464 }
 0x611   : > { %2571 = vst [vmem:[%s4706_s12 + $0x28] sm:$0xff] %v2539_v46  ;;  %v2538_v1 = vmul.f32 %v3291_v23, %v4603_v29  ;;  %3304 = vrcp.f32 %v2465_v2 }
 0x612   : > { %v3293_v16 = vpop.eup %3292  ;;  %v2463_v0 = vpop.xlane.xlu0 %2462 }
 0x613   : > { %2570 = vst [vmem:[%s4706_s12 + $0x20] sm:$0xff] %v2538_v1  ;;  %v2541_v13 = vmul.f32 %v3293_v16, %v4607_v60  ;;  %3306 = vrcp.f32 %v2463_v0 }
 0x614   : > { %v3295_v14 = vpop.eup %3294  ;;  %v2469_v17 = vpop.xlane.xlu1 %2468 }
 0x615   : > { %2573 = vst [vmem:[%s4706_s12 + $0x38] sm:$0xff] %v2541_v13  ;;  %v2540_v43 = vmul.f32 %v3295_v14, %v4611_v35  ;;  %3308 = vrcp.f32 %v2469_v17 }
 0x616   : > { %v3297_v51 = vpop.eup %3296  ;;  %v2467_v49 = vpop.xlane.xlu0 %2466 }
 0x617   : > { %2572 = vst [vmem:[%s4706_s12 + $0x30] sm:$0xff] %v2540_v43  ;;  %v2543_v29 = vmul.f32 %v3297_v51, %v4615_v62  ;;  %3310 = vrcp.f32 %v2467_v49 }
 0x618   : > { %v3299_v59 = vpop.eup %3298  ;;  %v2473_v45 = vpop.xlane.xlu1 %2472 }
 0x619   : > { %2575 = vst [vmem:[%s4706_s12 + $0x48] sm:$0xff] %v2543_v29  ;;  %v2542_v60 = vmul.f32 %v3299_v59, %v4619_v25  ;;  %3312 = vrcp.f32 %v2473_v45 }
 0x61a   : > { %v3301_v8 = vpop.eup %3300  ;;  %v2471_v20 = vpop.xlane.xlu0 %2470 }
 0x61b   : > { %2574 = vst [vmem:[%s4706_s12 + $0x40] sm:$0xff] %v2542_v60  ;;  %v2545_v35 = vmul.f32 %v3301_v8, %v4623_v27  ;;  %3314 = vrcp.f32 %v2471_v20 }
 0x61c   : > { %v3303_v52 = vpop.eup %3302  ;;  %v2477_v7 = vpop.xlane.xlu1 %2476 }
 0x61d   : > { %2577 = vst [vmem:[%s4706_s12 + $0x58] sm:$0xff] %v2545_v35  ;;  %v2544_v62 = vmul.f32 %v3303_v52, %v4627_v11  ;;  %3316 = vrcp.f32 %v2477_v7 }
 0x61e   : > { %v3305_v40 = vpop.eup %3304  ;;  %v2475_v30 = vpop.xlane.xlu0 %2474 }
 0x61f   : > { %2576 = vst [vmem:[%s4706_s12 + $0x50] sm:$0xff] %v2544_v62  ;;  %v2547_v25 = vmul.f32 %v3305_v40, %v4631_v3  ;;  %3318 = vrcp.f32 %v2475_v30 }
 0x620   : > { %v3307_v63 = vpop.eup %3306  ;;  %v2481_v36 = vpop.xlane.xlu1 %2480 }
 0x621   : > { %2579 = vst [vmem:[%s4706_s12 + $0x68] sm:$0xff] %v2547_v25  ;;  %v2546_v27 = vmul.f32 %v3307_v63, %v4635_v9  ;;  %3320 = vrcp.f32 %v2481_v36 }
 0x622   : > { %v3309_v53 = vpop.eup %3308  ;;  %v2479_v33 = vpop.xlane.xlu0 %2478 }
 0x623   : > { %2578 = vst [vmem:[%s4706_s12 + $0x60] sm:$0xff] %v2546_v27  ;;  %v2549_v11 = vmul.f32 %v3309_v53, %v4639_v57  ;;  %3322 = vrcp.f32 %v2479_v33 }
 0x624   : > { %v3311_v4 = vpop.eup %3310  ;;  %v2485_v54 = vpop.xlane.xlu1 %2484 }
 0x625   : > { %2581 = vst [vmem:[%s4706_s12 + $0x78] sm:$0xff] %v2549_v11  ;;  %v2548_v3 = vmul.f32 %v3311_v4, %v4643_v24  ;;  %3324 = vrcp.f32 %v2485_v54 }
 0x626   : > { %v3313_v38 = vpop.eup %3312  ;;  %v2483_v19 = vpop.xlane.xlu0 %2482 }
 0x627   : > { %2580 = vst [vmem:[%s4706_s12 + $0x70] sm:$0xff] %v2548_v3  ;;  %v2551_v9 = vmul.f32 %v3313_v38, %v4647_v18  ;;  %3326 = vrcp.f32 %v2483_v19 }
 0x628   : > { %v3315_v15 = vpop.eup %3314  ;;  %v2489_v22 = vpop.xlane.xlu1 %2488 }
 0x629   : > { %2583 = vst [vmem:[%s4706_s12 + $0x88] sm:$0xff] %v2551_v9  ;;  %v2550_v57 = vmul.f32 %v3315_v15, %v4651_v39  ;;  %3328 = vrcp.f32 %v2489_v22 }
 0x62a   : > { %v3317_v31 = vpop.eup %3316  ;;  %v2487_v44 = vpop.xlane.xlu0 %2486 }
 0x62b   : > { %2582 = vst [vmem:[%s4706_s12 + $0x80] sm:$0xff] %v2550_v57  ;;  %v2553_v24 = vmul.f32 %v3317_v31, %v4655_v34  ;;  %3330 = vrcp.f32 %v2487_v44 }
 0x62c   : > { %v3319_v42 = vpop.eup %3318  ;;  %v2493_v41 = vpop.xlane.xlu1 %2492 }
 0x62d   : > { %2585 = vst [vmem:[%s4706_s12 + $0x98] sm:$0xff] %v2553_v24  ;;  %v2552_v18 = vmul.f32 %v3319_v42, %v4659_v37  ;;  %3332 = vrcp.f32 %v2493_v41 }
 0x62e   : > { %v3321_v26 = vpop.eup %3320  ;;  %v2491_v10 = vpop.xlane.xlu0 %2490 }
 0x62f   : > { %2584 = vst [vmem:[%s4706_s12 + $0x90] sm:$0xff] %v2552_v18  ;;  %v2555_v39 = vmul.f32 %v3321_v26, %v4663_v21  ;;  %3334 = vrcp.f32 %v2491_v10 }
 0x630   : > { %v3323_v12 = vpop.eup %3322  ;;  %v2497_v46 = vpop.xlane.xlu1 %2496 }
 0x631   : > { %2587 = vst [vmem:[%s4706_s12 + $0xa8] sm:$0xff] %v2555_v39  ;;  %v2554_v34 = vmul.f32 %v3323_v12, %v4667_v47  ;;  %3336 = vrcp.f32 %v2497_v46 }
 0x632   : > { %v3325_v23 = vpop.eup %3324  ;;  %v2495_v2 = vpop.xlane.xlu0 %2494 }
 0x633   : > { %2586 = vst [vmem:[%s4706_s12 + $0xa0] sm:$0xff] %v2554_v34  ;;  %v2557_v37 = vmul.f32 %v3325_v23, %v4671_v50  ;;  %3338 = vrcp.f32 %v2495_v2 }
 0x634   : > { %v3327_v1 = vpop.eup %3326  ;;  %v2501_v16 = vpop.xlane.xlu1 %2500 }
 0x635   : > { %2589 = vst [vmem:[%s4706_s12 + $0xb8] sm:$0xff] %v2557_v37  ;;  %v2556_v21 = vmul.f32 %v3327_v1, %v4675_v55  ;;  %3340 = vrcp.f32 %v2501_v16 }
 0x636   : > { %v3329_v0 = vpop.eup %3328  ;;  %v2499_v13 = vpop.xlane.xlu0 %2498 }
 0x637   : > { %2588 = vst [vmem:[%s4706_s12 + $0xb0] sm:$0xff] %v2556_v21  ;;  %v2559_v47 = vmul.f32 %v3329_v0, %v4678_v6  ;;  %3342 = vrcp.f32 %v2499_v13 }
 0x638   : > { %v3331_v14 = vpop.eup %3330 }
 0x639   : > { %2591 = vst [vmem:[%s4706_s12 + $0xc8] sm:$0xff] %v2559_v47  ;;  %v2558_v50 = vmul.f32 %v3331_v14, %v4681_v32 }
 0x63a   : > { %v3333_v17 = vpop.eup %3332 }
 0x63b   : > { %2590 = vst [vmem:[%s4706_s12 + $0xc0] sm:$0xff] %v2558_v50  ;;  %v2561_v55 = vmul.f32 %v3333_v17, %v4684_v61 }
 0x63c   : > { %v3335_v43 = vpop.eup %3334 }
 0x63d   : > { %2593 = vst [vmem:[%s4706_s12 + $0xd8] sm:$0xff] %v2561_v55  ;;  %v2560_v51 = vmul.f32 %v3335_v43, %v4687_v56 }
 0x63e   : > { %v3337_v49 = vpop.eup %3336 }
 0x63f   : > { %2592 = vst [vmem:[%s4706_s12 + $0xd0] sm:$0xff] %v2560_v51  ;;  %v2563_v6 = vmul.f32 %v3337_v49, %v4690_v58 }
 0x640   : > { %v3339_v29 = vpop.eup %3338 }
 0x641   : > { %2595 = vst [vmem:[%s4706_s12 + $0xe8] sm:$0xff] %v2563_v6  ;;  %v2562_v32 = vmul.f32 %v3339_v29, %v4693_v5 }
 0x642   : > { %v3341_v59 = vpop.eup %3340 }
 0x643   : > { %2594 = vst [vmem:[%s4706_s12 + $0xe0] sm:$0xff] %v2562_v32  ;;  %v2565_v61 = vmul.f32 %v3341_v59, %v4696_v48 }
 0x644   : > { %v3343_v45 = vpop.eup %3342 }
 0x645   : > { %2597 = vst [vmem:[%s4706_s12 + $0xf8] sm:$0xff] %v2565_v61  ;;  %v2564_v56 = vmul.f32 %v3343_v45, %v4699_v28 }
 0x647   : > { %2596 = vst [vmem:[%s4706_s12 + $0xf0] sm:$0xff] %v2564_v56 }
 0x648   : > { %3357 = shalt.err (!%p3354_p3)
}
 0x649   : > { %s3358_s6 = scalar_lea.hbm %s4773_s17, 4096  ;;  %s3362_s9 = scalar_lea.hbm %s4827_s5, 16384 }
 0x64a   : > { %p3359_p4 = scmp.ne.s32.totalorder %s4773_s17, %s3358_s6  ;;  %p3363_p9 = scmp.lt.s32.totalorder %s4773_s17, %s4827_s5 }
 0x64b   : > { %p3364_p10 = scmp.lt.s32.totalorder %s3362_s9, %s3358_s6 }
 0x64c   : > { %p3360_p7 = pnand %p3359_p4, %p3477_p5 }
 0x64d   : > { %p3365_p11 = por %p3364_p10, %p3363_p9 }
 0x64e   : > { %p3361_p8 = pneg %p3360_p7 }
 0x650   : > { %p3366_p12 = pnand %p3365_p11, %p3361_p8 }
 0x652   : > { %3369 = shalt.err (!%p3366_p12)
}
 0x653   : > { %s3407_s12 = smov 128   ;;  %s3408_s13 = smov 8  }
 0x654   : > { %3047 = dma.vmem_to_hbm [thread:$0]  (%p3477_p5), %s4775_s14, 4096, %s4773_s17, %s4782_s22, %s3407_s12, %s3407_s12, %s3408_s13  }
 0x655 PF: > { %p3053_p13 = scmp.ge.s32.totalorder %s3404_s21, 2  ;;  %s2627_s15 = sand.u32 1, %s3392_s18  }
 0x656   : > { %s2628_s16 = scalar_lea.sflag [#allocation3], %s2627_s15 }
 0x657   : > { %p3050_p0 = pnand %p3053_p13, %p3481_p6 }
 0x659   : > { %p3051_p1 = pneg %p3050_p0 }
 0x65b   : > { %3387 = dma.done.wait (%p3051_p1), %s2628_s16, 4096  }
 0x65c   : > { %3389 = vsyncadd (%p3051_p1), %s2628_s16, 4294963200  ;;  %p15_p2 = scmp.ge.s32.totalorder %s3464_s24, 6   ;;  %s4830_s18 = smov %s3396_s19 }
 0x65d   : > { %s4831_s19 = smov %s3400_s20  ;;  %s4832_s20 = smov %s3475_s27 }
 0x65e   : > { %s4833_s21 = smov %s3464_s24  ;;  %17 = sbr.rel (!%p15_p2) target bundleno = 3 (0x3), region = 75 }
 0x663   :  { %2633 = vsyncpa [#allocation3], 1 }
 0x664   :  { %2635 = vsyncpa [#allocation3 + $0x1], 1 }

</bundles_post_ra>
